<compile_context>
chip_gen: v7x
topology: tpu7x:2x2x1
jax: 0.10.0
libtpu: 0.0.40
codegen_flags: <defaults>
</compile_context>

<pallas_src>
import functools
import math

import jax
import jax.numpy as jnp
from jax.experimental import pallas as pl
from jax.experimental.pallas import tpu as pltpu


def _mca_kernel(x_ref, wqkv_ref, bqkv_ref, wp_ref, bp_ref, bias_ref,
                o_ref, attn_scratch, *, n_heads: int):
    """One row-tile of block_b batch elements.

    x_ref        : (Bb, T, C)   input tokens.
    wqkv_ref     : (C, 3C)      fused [q|k|v] projection (q cols pre-scaled by 1/sqrt(D)).
    bqkv_ref     : (1, 3C)      fused bias (q part pre-scaled).
    wp_ref       : (C, C)       output projection weight.
    bp_ref       : (1, C)       output projection bias.
    bias_ref     : (T, T)       additive causal mask (0 / -1e30).
    o_ref        : (Bb, T*C)    lane-dense output tile.
    attn_scratch : (Bb, T, C)   VMEM scratch used to merge heads back to (M, C).
    """
    Bb, T, C = x_ref.shape
    H = n_heads
    D = C // H
    M = Bb * T

    x = x_ref[...].reshape(M, C)

    # --- Fused q|k|v projection: one wide MXU matmul (1/sqrt(D) folded into q).
    qkv = jnp.dot(x, wqkv_ref[...], preferred_element_type=jnp.float32) + bqkv_ref[...]
    qkv = qkv.reshape(Bb, T, 3 * C)

    # --- Split heads onto a leading batch axis: (H*Bb, T, D).
    def split_heads(off):
        parts = [qkv[:, :, off + h * D: off + (h + 1) * D] for h in range(H)]
        return jnp.stack(parts, axis=0).reshape(H * Bb, T, D)

    q = split_heads(0)
    k = split_heads(C)
    v = split_heads(2 * C)

    # --- Batched attention over all (head, batch) pairs (scores carry 1/sqrt(D)).
    scores = jnp.einsum("ntd,nsd->nts", q, k, preferred_element_type=jnp.float32)
    scores = scores + bias_ref[...][None, :, :]

    m = jnp.max(scores, axis=-1, keepdims=True)
    e = jnp.exp(scores - m)
    s = jnp.sum(e, axis=-1, keepdims=True)
    attn = jnp.einsum("nts,nsd->ntd", e, v, preferred_element_type=jnp.float32)
    attn = attn / s                      # exact, deferred softmax normalization

    # --- Merge heads back to an (M, C) tile through VMEM scratch (lane-offset
    #     stores), then ONE fused output-projection matmul.
    attn = attn.reshape(H, Bb, T, D)
    for h in range(H):                   # static, data-movement only (no MXU ops)
        attn_scratch[:, :, h * D:(h + 1) * D] = attn[h]
    merged = attn_scratch[...].reshape(M, C)
    out = jnp.dot(merged, wp_ref[...], preferred_element_type=jnp.float32) + bp_ref[...]

    # --- Lane-dense store: o_ref last dim is T*C, so the HBM writeback DMA is dense.
    out = out.reshape(Bb, T, C)
    for t in range(T):                   # static assembly into the 256-lane slab
        o_ref[:, t * C:(t + 1) * C] = out[:, t, :].astype(o_ref.dtype)


def _tensorcores_per_chip():
    """v7x has 2 TensorCores per chip; v5e/v6e have 1."""
    try:
        kind = jax.devices()[0].device_kind.lower()
    except Exception:
        return 1
    return 2 if ("v7" in kind or "7x" in kind) else 1


def _choose_block_b(B, T, C, n_cores, tile_budget_bytes=8 << 20):
    """Batch elements per grid step.

    Single-TC chips (v5e/v6e): one grid step when the tile fits (the grid is a
    sequential loop, extra steps only add ~0.35us/step pipeline overhead).
    Dual-TC chips (v7x): prefer an even number of grid steps so both cores get
    work.  The output block's sublane dim (block_b) must be a multiple of 8 or
    the full batch to stay layout-legal.
    """
    def legal(bb):
        return B % bb == 0 and (bb == B or bb % 8 == 0)

    def fits(bb):
        # Coarse: x/out tiles (double-buffered) + qkv/attn intermediates.
        return 8 * bb * T * C * 4 <= tile_budget_bytes

    candidates = [bb for bb in range(B, 0, -1) if legal(bb)]
    if n_cores >= 2:
        for bb in candidates:
            steps = B // bb
            if steps >= 2 and steps % 2 == 0 and fits(bb):
                return bb
    for bb in candidates:
        if fits(bb):
            return bb
    return candidates[-1]


def _invariant_spec(shape, single_buffer):
    """Grid-invariant (constant index_map) BlockSpec; optionally single-buffered."""
    index_map = lambda i: (0,) * len(shape)
    if single_buffer:
        try:
            return pl.BlockSpec(shape, index_map, pipeline_mode=pl.Buffered(1))
        except Exception:
            pass
    return pl.BlockSpec(shape, index_map)


def masked_causal_attention(x, params, n_heads, block_b=None):
    """x: (B, T, C) float32. params: dict of (C, C) weights and (1, C) biases."""
    B, T, C = x.shape
    assert C % n_heads == 0
    D = C // n_heads
    TC = T * C

    n_cores = _tensorcores_per_chip()
    if block_b is None:
        block_b = _choose_block_b(B, T, C, n_cores)
    assert B % block_b == 0
    grid_b = B // block_b

    inv_sqrt_d = 1.0 / math.sqrt(D)

    # HBM-side layout plumbing (outside the kernel, effectively free):
    # fuse q/k/v weights into one (C, 3C) matrix, fold 1/sqrt(D) into the q part.
    w_qkv = jnp.concatenate(
        [params["wq"] * inv_sqrt_d, params["wk"], params["wv"]], axis=1)       # (C, 3C)
    b_qkv = jnp.concatenate(
        [params["bq"] * inv_sqrt_d, params["bk"], params["bv"]], axis=1)       # (1, 3C)
    wp = params["wp"]                                                          # (C, C)
    bp = params["bp"]                                                          # (1, C)

    # Additive causal bias, built once (grid-invariant input).
    mask_bias = jnp.where(jnp.tril(jnp.ones((T, T), dtype=bool)),
                          0.0, -1e30).astype(jnp.float32)

    single_buffer = grid_b > 1
    x_spec = pl.BlockSpec((block_b, T, C), lambda i: (i, 0, 0))
    o_spec = pl.BlockSpec((block_b, TC), lambda i: (i, 0))
    in_specs = [
        x_spec,
        _invariant_spec((C, 3 * C), single_buffer),
        _invariant_spec((1, 3 * C), single_buffer),
        _invariant_spec((C, C), single_buffer),
        _invariant_spec((1, C), single_buffer),
        _invariant_spec((T, T), single_buffer),
    ]

    kernel = functools.partial(_mca_kernel, n_heads=n_heads)

    # TODO(synk): for very large C, set vmem_limit_bytes explicitly (v7x has
    #             64 MiB physical / 32 MiB default scoped); unnecessary here.
    out2 = pl.pallas_call(
        kernel,
        out_shape=jax.ShapeDtypeStruct((B, TC), jnp.float32),
        grid_spec=pltpu.PrefetchScalarGridSpec(
            num_scalar_prefetch=0,
            grid=(grid_b,),
            in_specs=in_specs,
            out_specs=o_spec,
            scratch_shapes=[pltpu.VMEM((block_b, T, C), jnp.float32)],
        ),
        compiler_params=pltpu.CompilerParams(
            dimension_semantics=("parallel",)),
    )(x, w_qkv, b_qkv, wp, bp, mask_bias)

    return out2.reshape(B, T, C)


def _reference(x, params, n_heads):
    """Pure-JAX reference mirroring the PyTorch forward (eval mode)."""
    B, T, C = x.shape
    D = C // n_heads

    def lin(a, w, b):
        return a @ w + b

    q = lin(x, params["wq"], params["bq"]).reshape(B, T, n_heads, D).transpose(0, 2, 1, 3)
    k = lin(x, params["wk"], params["bk"]).reshape(B, T, n_heads, D).transpose(0, 2, 1, 3)
    v = lin(x, params["wv"], params["bv"]).reshape(B, T, n_heads, D).transpose(0, 2, 1, 3)

    w = jnp.einsum("bntd,bnsd->bnts", q, k) / math.sqrt(D)
    mask = jnp.tril(jnp.ones((T, T), dtype=bool))
    w = jnp.where(mask[None, None], w, -jnp.inf)
    p = jax.nn.softmax(w, axis=-1)
    attn = jnp.einsum("bnts,bnsd->bntd", p, v)
    attn = attn.transpose(0, 2, 1, 3).reshape(B, T, C)
    return lin(attn, params["wp"], params["bp"])


def init_params(key, h_dim):
    """Deterministic PyTorch-Linear-style init: U(-1/sqrt(in), 1/sqrt(in))."""
    bound = 1.0 / math.sqrt(h_dim)
    ks = jax.random.split(key, 8)
    u = lambda k, shape: jax.random.uniform(
        k, shape, jnp.float32, minval=-bound, maxval=bound)
    return {
        "wq": u(ks[0], (h_dim, h_dim)), "bq": u(ks[1], (1, h_dim)),
        "wk": u(ks[2], (h_dim, h_dim)), "bk": u(ks[3], (1, h_dim)),
        "wv": u(ks[4], (h_dim, h_dim)), "bv": u(ks[5], (1, h_dim)),
        "wp": u(ks[6], (h_dim, h_dim)), "bp": u(ks[7], (1, h_dim)),
    }


if __name__ == "__main__":
    B, T, h_dim, n_heads, max_T = 8, 8, 32, 4, 16
    assert T <= max_T

    key = jax.random.PRNGKey(0)
    kx, kp = jax.random.split(key)
    x = jax.random.normal(kx, (B, T, h_dim), dtype=jnp.float32)
    params = init_params(kp, h_dim)

    out = masked_causal_attention(x, params, n_heads)
    out = jax.block_until_ready(out)

    ref = _reference(x, params, n_heads)
    assert out.shape == (B, T, h_dim)
    # f32 compute (reference module is f64) with exact softmax normalization.
    assert jnp.allclose(out, ref, atol=1e-3, rtol=1e-3), "mismatch vs reference"

    print("KERNEL_OK")
</pallas_src>

<mosaic_0001>
module attributes {stable_mosaic.version = 11 : i64} {
  func.func @_mca_kernel(%arg0: i32, %arg1: memref<8x8x32xf32, #tpu.memory_space<vmem>>, %arg2: memref<32x96xf32, #tpu.memory_space<vmem>>, %arg3: memref<1x96xf32, #tpu.memory_space<vmem>>, %arg4: memref<32x32xf32, #tpu.memory_space<vmem>>, %arg5: memref<1x32xf32, #tpu.memory_space<vmem>>, %arg6: memref<8x8xf32, #tpu.memory_space<vmem>>, %arg7: memref<8x256xf32, #tpu.memory_space<vmem>>, %arg8: memref<8x8x32xf32, #tpu.memory_space<vmem>>) attributes {dimension_semantics = [#tpu.dimension_semantics<parallel>], iteration_bounds = array<i64: 1>, scalar_prefetch = 0 : i64, scratch_operands = 1 : i64, tpu.core_type = #tpu.core_type<tc>, window_params = [{transform_indices = @transform_0, window_bounds = array<i64: 8, 8, 32>}, {pipeline_mode = #tpu.pipeline_mode<synchronous>, transform_indices = @transform_1, window_bounds = array<i64: 32, 96>}, {pipeline_mode = #tpu.pipeline_mode<synchronous>, transform_indices = @transform_2, window_bounds = array<i64: 1, 96>}, {pipeline_mode = #tpu.pipeline_mode<synchronous>, transform_indices = @transform_3, window_bounds = array<i64: 32, 32>}, {pipeline_mode = #tpu.pipeline_mode<synchronous>, transform_indices = @transform_4, window_bounds = array<i64: 1, 32>}, {pipeline_mode = #tpu.pipeline_mode<synchronous>, transform_indices = @transform_5, window_bounds = array<i64: 8, 8>}, {transform_indices = @transform_6, window_bounds = array<i64: 8, 256>}]} {
    %c0 = arith.constant 0 : index
    %c0_0 = arith.constant 0 : index
    %c0_1 = arith.constant 0 : index
    %0 = vector.load %arg1[%c0, %c0_0, %c0_1] : memref<8x8x32xf32, #tpu.memory_space<vmem>>, vector<8x8x32xf32>
    %1 = vector.shape_cast %0 : vector<8x8x32xf32> to vector<64x32xf32>
    %c0_2 = arith.constant 0 : index
    %c0_3 = arith.constant 0 : index
    %2 = vector.load %arg2[%c0_2, %c0_3] : memref<32x96xf32, #tpu.memory_space<vmem>>, vector<32x96xf32>
    %cst = arith.constant dense<0.000000e+00> : vector<64x96xf32>
    %3 = tpu.matmul %1, %2, %cst {dimension_numbers = #tpu.dot_dimension_numbers<[1], [0], [0], [1], [0, 0, 1, 1], [], []>} : vector<64x32xf32>, vector<32x96xf32>, vector<64x96xf32> -> vector<64x96xf32>
    %c0_4 = arith.constant 0 : index
    %c0_5 = arith.constant 0 : index
    %4 = vector.load %arg3[%c0_4, %c0_5] : memref<1x96xf32, #tpu.memory_space<vmem>>, vector<1x96xf32>
    %5 = vector.broadcast %4 : vector<1x96xf32> to vector<64x96xf32>
    %6 = arith.addf %3, %5 : vector<64x96xf32>
    %7 = vector.shape_cast %6 : vector<64x96xf32> to vector<8x8x96xf32>
    %8 = vector.extract_strided_slice %7 {offsets = [0, 0, 0], sizes = [8, 8, 8], strides = [1, 1, 1]} : vector<8x8x96xf32> to vector<8x8x8xf32>
    %9 = vector.extract_strided_slice %7 {offsets = [0, 0, 8], sizes = [8, 8, 8], strides = [1, 1, 1]} : vector<8x8x96xf32> to vector<8x8x8xf32>
    %10 = vector.extract_strided_slice %7 {offsets = [0, 0, 16], sizes = [8, 8, 8], strides = [1, 1, 1]} : vector<8x8x96xf32> to vector<8x8x8xf32>
    %11 = vector.extract_strided_slice %7 {offsets = [0, 0, 24], sizes = [8, 8, 8], strides = [1, 1, 1]} : vector<8x8x96xf32> to vector<8x8x8xf32>
    %12 = vector.shape_cast %8 : vector<8x8x8xf32> to vector<1x8x8x8xf32>
    %13 = vector.shape_cast %9 : vector<8x8x8xf32> to vector<1x8x8x8xf32>
    %14 = vector.shape_cast %10 : vector<8x8x8xf32> to vector<1x8x8x8xf32>
    %15 = vector.shape_cast %11 : vector<8x8x8xf32> to vector<1x8x8x8xf32>
    %16 = tpu.concatenate %12, %13, %14, %15 in 0 : vector<1x8x8x8xf32>, vector<1x8x8x8xf32>, vector<1x8x8x8xf32>, vector<1x8x8x8xf32> -> vector<4x8x8x8xf32>
    %17 = vector.shape_cast %16 : vector<4x8x8x8xf32> to vector<32x8x8xf32>
    %18 = vector.extract_strided_slice %7 {offsets = [0, 0, 32], sizes = [8, 8, 8], strides = [1, 1, 1]} : vector<8x8x96xf32> to vector<8x8x8xf32>
    %19 = vector.extract_strided_slice %7 {offsets = [0, 0, 40], sizes = [8, 8, 8], strides = [1, 1, 1]} : vector<8x8x96xf32> to vector<8x8x8xf32>
    %20 = vector.extract_strided_slice %7 {offsets = [0, 0, 48], sizes = [8, 8, 8], strides = [1, 1, 1]} : vector<8x8x96xf32> to vector<8x8x8xf32>
    %21 = vector.extract_strided_slice %7 {offsets = [0, 0, 56], sizes = [8, 8, 8], strides = [1, 1, 1]} : vector<8x8x96xf32> to vector<8x8x8xf32>
    %22 = vector.shape_cast %18 : vector<8x8x8xf32> to vector<1x8x8x8xf32>
    %23 = vector.shape_cast %19 : vector<8x8x8xf32> to vector<1x8x8x8xf32>
    %24 = vector.shape_cast %20 : vector<8x8x8xf32> to vector<1x8x8x8xf32>
    %25 = vector.shape_cast %21 : vector<8x8x8xf32> to vector<1x8x8x8xf32>
    %26 = tpu.concatenate %22, %23, %24, %25 in 0 : vector<1x8x8x8xf32>, vector<1x8x8x8xf32>, vector<1x8x8x8xf32>, vector<1x8x8x8xf32> -> vector<4x8x8x8xf32>
    %27 = vector.shape_cast %26 : vector<4x8x8x8xf32> to vector<32x8x8xf32>
    %28 = vector.extract_strided_slice %7 {offsets = [0, 0, 64], sizes = [8, 8, 8], strides = [1, 1, 1]} : vector<8x8x96xf32> to vector<8x8x8xf32>
    %29 = vector.extract_strided_slice %7 {offsets = [0, 0, 72], sizes = [8, 8, 8], strides = [1, 1, 1]} : vector<8x8x96xf32> to vector<8x8x8xf32>
    %30 = vector.extract_strided_slice %7 {offsets = [0, 0, 80], sizes = [8, 8, 8], strides = [1, 1, 1]} : vector<8x8x96xf32> to vector<8x8x8xf32>
    %31 = vector.extract_strided_slice %7 {offsets = [0, 0, 88], sizes = [8, 8, 8], strides = [1, 1, 1]} : vector<8x8x96xf32> to vector<8x8x8xf32>
    %32 = vector.shape_cast %28 : vector<8x8x8xf32> to vector<1x8x8x8xf32>
    %33 = vector.shape_cast %29 : vector<8x8x8xf32> to vector<1x8x8x8xf32>
    %34 = vector.shape_cast %30 : vector<8x8x8xf32> to vector<1x8x8x8xf32>
    %35 = vector.shape_cast %31 : vector<8x8x8xf32> to vector<1x8x8x8xf32>
    %36 = tpu.concatenate %32, %33, %34, %35 in 0 : vector<1x8x8x8xf32>, vector<1x8x8x8xf32>, vector<1x8x8x8xf32>, vector<1x8x8x8xf32> -> vector<4x8x8x8xf32>
    %37 = vector.shape_cast %36 : vector<4x8x8x8xf32> to vector<32x8x8xf32>
    "tpu.trace_start"() <{level = 10 : i32, message = "ntd,nsd->nts"}> : () -> ()
    %cst_6 = arith.constant dense<0.000000e+00> : vector<32x8x8xf32>
    %38 = tpu.matmul %17, %27, %cst_6 {dimension_numbers = #tpu.dot_dimension_numbers<[2], [2], [1], [1], [0, 0, 0, 1, 1, 1], [0], [0]>} : vector<32x8x8xf32>, vector<32x8x8xf32>, vector<32x8x8xf32> -> vector<32x8x8xf32>
    "tpu.trace_stop"() : () -> ()
    %c0_7 = arith.constant 0 : index
    %c0_8 = arith.constant 0 : index
    %39 = vector.load %arg6[%c0_7, %c0_8] : memref<8x8xf32, #tpu.memory_space<vmem>>, vector<8x8xf32>
    %40 = vector.shape_cast %39 : vector<8x8xf32> to vector<1x8x8xf32>
    %41 = vector.broadcast %40 : vector<1x8x8xf32> to vector<32x8x8xf32>
    %42 = arith.addf %38, %41 : vector<32x8x8xf32>
    %cst_9 = arith.constant dense<0xFF800000> : vector<32x8xf32>
    %43 = vector.multi_reduction <maximumf>, %42, %cst_9 [2] : vector<32x8x8xf32> to vector<32x8xf32>
    %44 = vector.shape_cast %43 : vector<32x8xf32> to vector<32x8x1xf32>
    %45 = vector.broadcast %44 : vector<32x8x1xf32> to vector<32x8x8xf32>
    %46 = arith.subf %42, %45 : vector<32x8x8xf32>
    %47 = math.exp %46 : vector<32x8x8xf32>
    %cst_10 = arith.constant dense<0.000000e+00> : vector<32x8xf32>
    %48 = vector.multi_reduction <add>, %47, %cst_10 [2] : vector<32x8x8xf32> to vector<32x8xf32>
    %49 = vector.shape_cast %48 : vector<32x8xf32> to vector<32x8x1xf32>
    "tpu.trace_start"() <{level = 10 : i32, message = "nts,nsd->ntd"}> : () -> ()
    %cst_11 = arith.constant dense<0.000000e+00> : vector<32x8x8xf32>
    %50 = tpu.matmul %47, %37, %cst_11 {dimension_numbers = #tpu.dot_dimension_numbers<[2], [1], [1], [2], [0, 0, 0, 1, 1, 2], [0], [0]>} : vector<32x8x8xf32>, vector<32x8x8xf32>, vector<32x8x8xf32> -> vector<32x8x8xf32>
    "tpu.trace_stop"() : () -> ()
    %51 = vector.broadcast %49 : vector<32x8x1xf32> to vector<32x8x8xf32>
    %52 = arith.divf %50, %51 : vector<32x8x8xf32>
    %53 = vector.shape_cast %52 : vector<32x8x8xf32> to vector<4x8x8x8xf32>
    %54 = vector.extract_strided_slice %53 {offsets = [0, 0, 0, 0], sizes = [1, 8, 8, 8], strides = [1, 1, 1, 1]} : vector<4x8x8x8xf32> to vector<1x8x8x8xf32>
    %55 = vector.shape_cast %54 : vector<1x8x8x8xf32> to vector<8x8x8xf32>
    %c0_12 = arith.constant 0 : index
    %c0_13 = arith.constant 0 : index
    %c0_14 = arith.constant 0 : index
    %56 = vector.load %arg8[%c0_12, %c0_13, %c0_14] : memref<8x8x32xf32, #tpu.memory_space<vmem>>, vector<8x8x8xf32>
    tpu.vector_store %arg8[%c0_12, %c0_13, %c0_14], %55 {strides = array<i32>} : memref<8x8x32xf32, #tpu.memory_space<vmem>>, vector<8x8x8xf32>,
    %57 = vector.extract_strided_slice %53 {offsets = [1, 0, 0, 0], sizes = [1, 8, 8, 8], strides = [1, 1, 1, 1]} : vector<4x8x8x8xf32> to vector<1x8x8x8xf32>
    %58 = vector.shape_cast %57 : vector<1x8x8x8xf32> to vector<8x8x8xf32>
    %c0_15 = arith.constant 0 : index
    %c0_16 = arith.constant 0 : index
    %c8 = arith.constant 8 : index
    %59 = vector.load %arg8[%c0_15, %c0_16, %c8] : memref<8x8x32xf32, #tpu.memory_space<vmem>>, vector<8x8x8xf32>
    tpu.vector_store %arg8[%c0_15, %c0_16, %c8], %58 {strides = array<i32>} : memref<8x8x32xf32, #tpu.memory_space<vmem>>, vector<8x8x8xf32>,
    %60 = vector.extract_strided_slice %53 {offsets = [2, 0, 0, 0], sizes = [1, 8, 8, 8], strides = [1, 1, 1, 1]} : vector<4x8x8x8xf32> to vector<1x8x8x8xf32>
    %61 = vector.shape_cast %60 : vector<1x8x8x8xf32> to vector<8x8x8xf32>
    %c0_17 = arith.constant 0 : index
    %c0_18 = arith.constant 0 : index
    %c16 = arith.constant 16 : index
    %62 = vector.load %arg8[%c0_17, %c0_18, %c16] : memref<8x8x32xf32, #tpu.memory_space<vmem>>, vector<8x8x8xf32>
    tpu.vector_store %arg8[%c0_17, %c0_18, %c16], %61 {strides = array<i32>} : memref<8x8x32xf32, #tpu.memory_space<vmem>>, vector<8x8x8xf32>,
    %63 = vector.extract_strided_slice %53 {offsets = [3, 0, 0, 0], sizes = [1, 8, 8, 8], strides = [1, 1, 1, 1]} : vector<4x8x8x8xf32> to vector<1x8x8x8xf32>
    %64 = vector.shape_cast %63 : vector<1x8x8x8xf32> to vector<8x8x8xf32>
    %c0_19 = arith.constant 0 : index
    %c0_20 = arith.constant 0 : index
    %c24 = arith.constant 24 : index
    %65 = vector.load %arg8[%c0_19, %c0_20, %c24] : memref<8x8x32xf32, #tpu.memory_space<vmem>>, vector<8x8x8xf32>
    tpu.vector_store %arg8[%c0_19, %c0_20, %c24], %64 {strides = array<i32>} : memref<8x8x32xf32, #tpu.memory_space<vmem>>, vector<8x8x8xf32>,
    %c0_21 = arith.constant 0 : index
    %c0_22 = arith.constant 0 : index
    %c0_23 = arith.constant 0 : index
    %66 = vector.load %arg8[%c0_21, %c0_22, %c0_23] : memref<8x8x32xf32, #tpu.memory_space<vmem>>, vector<8x8x32xf32>
    %67 = vector.shape_cast %66 : vector<8x8x32xf32> to vector<64x32xf32>
    %c0_24 = arith.constant 0 : index
    %c0_25 = arith.constant 0 : index
    %68 = vector.load %arg4[%c0_24, %c0_25] : memref<32x32xf32, #tpu.memory_space<vmem>>, vector<32x32xf32>
    %cst_26 = arith.constant dense<0.000000e+00> : vector<64x32xf32>
    %69 = tpu.matmul %67, %68, %cst_26 {dimension_numbers = #tpu.dot_dimension_numbers<[1], [0], [0], [1], [0, 0, 1, 1], [], []>} : vector<64x32xf32>, vector<32x32xf32>, vector<64x32xf32> -> vector<64x32xf32>
    %c0_27 = arith.constant 0 : index
    %c0_28 = arith.constant 0 : index
    %70 = vector.load %arg5[%c0_27, %c0_28] : memref<1x32xf32, #tpu.memory_space<vmem>>, vector<1x32xf32>
    %71 = vector.broadcast %70 : vector<1x32xf32> to vector<64x32xf32>
    %72 = arith.addf %69, %71 : vector<64x32xf32>
    %73 = vector.shape_cast %72 : vector<64x32xf32> to vector<8x8x32xf32>
    %74 = vector.extract_strided_slice %73 {offsets = [0, 0, 0], sizes = [8, 1, 32], strides = [1, 1, 1]} : vector<8x8x32xf32> to vector<8x1x32xf32>
    %75 = vector.shape_cast %74 : vector<8x1x32xf32> to vector<8x32xf32>
    %c0_29 = arith.constant 0 : index
    %c0_30 = arith.constant 0 : index
    %76 = vector.load %arg7[%c0_29, %c0_30] : memref<8x256xf32, #tpu.memory_space<vmem>>, vector<8x32xf32>
    tpu.vector_store %arg7[%c0_29, %c0_30], %75 {strides = array<i32>} : memref<8x256xf32, #tpu.memory_space<vmem>>, vector<8x32xf32>,
    %77 = vector.extract_strided_slice %73 {offsets = [0, 1, 0], sizes = [8, 1, 32], strides = [1, 1, 1]} : vector<8x8x32xf32> to vector<8x1x32xf32>
    %78 = vector.shape_cast %77 : vector<8x1x32xf32> to vector<8x32xf32>
    %c0_31 = arith.constant 0 : index
    %c32 = arith.constant 32 : index
    %79 = vector.load %arg7[%c0_31, %c32] : memref<8x256xf32, #tpu.memory_space<vmem>>, vector<8x32xf32>
    tpu.vector_store %arg7[%c0_31, %c32], %78 {strides = array<i32>} : memref<8x256xf32, #tpu.memory_space<vmem>>, vector<8x32xf32>,
    %80 = vector.extract_strided_slice %73 {offsets = [0, 2, 0], sizes = [8, 1, 32], strides = [1, 1, 1]} : vector<8x8x32xf32> to vector<8x1x32xf32>
    %81 = vector.shape_cast %80 : vector<8x1x32xf32> to vector<8x32xf32>
    %c0_32 = arith.constant 0 : index
    %c64 = arith.constant 64 : index
    %82 = vector.load %arg7[%c0_32, %c64] : memref<8x256xf32, #tpu.memory_space<vmem>>, vector<8x32xf32>
    tpu.vector_store %arg7[%c0_32, %c64], %81 {strides = array<i32>} : memref<8x256xf32, #tpu.memory_space<vmem>>, vector<8x32xf32>,
    %83 = vector.extract_strided_slice %73 {offsets = [0, 3, 0], sizes = [8, 1, 32], strides = [1, 1, 1]} : vector<8x8x32xf32> to vector<8x1x32xf32>
    %84 = vector.shape_cast %83 : vector<8x1x32xf32> to vector<8x32xf32>
    %c0_33 = arith.constant 0 : index
    %c96 = arith.constant 96 : index
    %85 = vector.load %arg7[%c0_33, %c96] : memref<8x256xf32, #tpu.memory_space<vmem>>, vector<8x32xf32>
    tpu.vector_store %arg7[%c0_33, %c96], %84 {strides = array<i32>} : memref<8x256xf32, #tpu.memory_space<vmem>>, vector<8x32xf32>,
    %86 = vector.extract_strided_slice %73 {offsets = [0, 4, 0], sizes = [8, 1, 32], strides = [1, 1, 1]} : vector<8x8x32xf32> to vector<8x1x32xf32>
    %87 = vector.shape_cast %86 : vector<8x1x32xf32> to vector<8x32xf32>
    %c0_34 = arith.constant 0 : index
    %c128 = arith.constant 128 : index
    %88 = vector.load %arg7[%c0_34, %c128] : memref<8x256xf32, #tpu.memory_space<vmem>>, vector<8x32xf32>
    tpu.vector_store %arg7[%c0_34, %c128], %87 {strides = array<i32>} : memref<8x256xf32, #tpu.memory_space<vmem>>, vector<8x32xf32>,
    %89 = vector.extract_strided_slice %73 {offsets = [0, 5, 0], sizes = [8, 1, 32], strides = [1, 1, 1]} : vector<8x8x32xf32> to vector<8x1x32xf32>
    %90 = vector.shape_cast %89 : vector<8x1x32xf32> to vector<8x32xf32>
    %c0_35 = arith.constant 0 : index
    %c160 = arith.constant 160 : index
    %91 = vector.load %arg7[%c0_35, %c160] : memref<8x256xf32, #tpu.memory_space<vmem>>, vector<8x32xf32>
    tpu.vector_store %arg7[%c0_35, %c160], %90 {strides = array<i32>} : memref<8x256xf32, #tpu.memory_space<vmem>>, vector<8x32xf32>,
    %92 = vector.extract_strided_slice %73 {offsets = [0, 6, 0], sizes = [8, 1, 32], strides = [1, 1, 1]} : vector<8x8x32xf32> to vector<8x1x32xf32>
    %93 = vector.shape_cast %92 : vector<8x1x32xf32> to vector<8x32xf32>
    %c0_36 = arith.constant 0 : index
    %c192 = arith.constant 192 : index
    %94 = vector.load %arg7[%c0_36, %c192] : memref<8x256xf32, #tpu.memory_space<vmem>>, vector<8x32xf32>
    tpu.vector_store %arg7[%c0_36, %c192], %93 {strides = array<i32>} : memref<8x256xf32, #tpu.memory_space<vmem>>, vector<8x32xf32>,
    %95 = vector.extract_strided_slice %73 {offsets = [0, 7, 0], sizes = [8, 1, 32], strides = [1, 1, 1]} : vector<8x8x32xf32> to vector<8x1x32xf32>
    %96 = vector.shape_cast %95 : vector<8x1x32xf32> to vector<8x32xf32>
    %c0_37 = arith.constant 0 : index
    %c224 = arith.constant 224 : index
    %97 = vector.load %arg7[%c0_37, %c224] : memref<8x256xf32, #tpu.memory_space<vmem>>, vector<8x32xf32>
    tpu.vector_store %arg7[%c0_37, %c224], %96 {strides = array<i32>} : memref<8x256xf32, #tpu.memory_space<vmem>>, vector<8x32xf32>,
    return
  }
  func.func @transform_0(%arg0: i32) -> (i32, i32, i32) {
    %c0_i32 = arith.constant 0 : i32
    %c0_i32_0 = arith.constant 0 : i32
    %c0_i32_1 = arith.constant 0 : i32
    return %arg0, %c0_i32, %c0_i32_0 : i32, i32, i32
  }
  func.func @transform_1(%arg0: i32) -> (i32, i32) {
    %c0_i32 = arith.constant 0 : i32
    %c0_i32_0 = arith.constant 0 : i32
    %c0_i32_1 = arith.constant 0 : i32
    return %c0_i32, %c0_i32_0 : i32, i32
  }
  func.func @transform_2(%arg0: i32) -> (i32, i32) {
    %c0_i32 = arith.constant 0 : i32
    %c0_i32_0 = arith.constant 0 : i32
    %c0_i32_1 = arith.constant 0 : i32
    return %c0_i32, %c0_i32_0 : i32, i32
  }
  func.func @transform_3(%arg0: i32) -> (i32, i32) {
    %c0_i32 = arith.constant 0 : i32
    %c0_i32_0 = arith.constant 0 : i32
    %c0_i32_1 = arith.constant 0 : i32
    return %c0_i32, %c0_i32_0 : i32, i32
  }
  func.func @transform_4(%arg0: i32) -> (i32, i32) {
    %c0_i32 = arith.constant 0 : i32
    %c0_i32_0 = arith.constant 0 : i32
    %c0_i32_1 = arith.constant 0 : i32
    return %c0_i32, %c0_i32_0 : i32, i32
  }
  func.func @transform_5(%arg0: i32) -> (i32, i32) {
    %c0_i32 = arith.constant 0 : i32
    %c0_i32_0 = arith.constant 0 : i32
    %c0_i32_1 = arith.constant 0 : i32
    return %c0_i32, %c0_i32_0 : i32, i32
  }
  func.func @transform_6(%arg0: i32) -> (i32, i32) {
    %c0_i32 = arith.constant 0 : i32
    %c0_i32_0 = arith.constant 0 : i32
    return %arg0, %c0_i32 : i32, i32
  }
}

</mosaic_0001>

<bundles_post_ra>
// kernel: tpu_custom_call.1
= control target key start
LH: loop header
LB: loop body
LE: loop exit
PB: predicated region body
PF: predicated region fallthrough
CT: control target
= control target key end

     0   :  { %11 = vsyncpa [#allocation4], 0  ;;  %s8144_s0 = inlined_call_operand.hbm [shape: f32[8,8,32], index: 0, kind: input, shape index: {}]   ;;  %s8145_s1 = inlined_call_operand.hbm [shape: f32[32,96], index: 1, kind: input, shape index: {}]   ;;  %s8146_s2 = inlined_call_operand.vmem [shape: f32[1,96], index: 2, kind: input, shape index: {}]   ;;  %s8147_s3 = inlined_call_operand.hbm [shape: f32[32,32], index: 3, kind: input, shape index: {}]   ;;  %s8148_s4 = inlined_call_operand.vmem [shape: f32[1,32], index: 4, kind: input, shape index: {}]   ;;  %s8149_s5 = inlined_call_operand.vmem [shape: f32[8,8], index: 5, kind: input, shape index: {}]   ;;  %s8150_s6 = inlined_call_operand.hbm [shape: f32[8,256], index: 6, kind: output, shape index: {}]  }
   0x1   :  { %12 = vsyncpa [#allocation7], 0 }
   0x2   :  { %13 = vsyncpa [#allocation5], 0  ;;  %s6821_s21 = smov [#allocation6]   ;;  %s6822_s23 = smov [#allocation3]  }
   0x3   :  { %s31_s22 = sshll.u32 %s6821_s21, 4  ;;  %s19_s24 = sshll.u32 %s6822_s23, 4  ;;  %s32_s22 = int_to_ptr.vmem [resolvable:$true] %s31_s22  ;;  %s6872_s24 = int_to_ptr.vmem [resolvable:$true] %s19_s24 }
   0x4   :  { %s6727_s27 = scalar_lea.hbm %s8145_s1, 512 }
   0x5   :  { %p6728_p0 = scmp.ne.s32.totalorder %s8145_s1, %s6727_s27  ;;  %p6731_p1 = scmp.lt.u32.totalorder %s6727_s27, %s8145_s1 }
   0x7   :  { %p6733_p2 = pnand %p6731_p1, %p6728_p0 }
   0x9   :  { %6736 = shalt.err (!%p6733_p2)
}
   0xa   :  { %s6737_s8 = scalar_lea.vmem %s32_s22, 512  ;;  %p6742_p4 = scmp.lt.s32.totalorder %s32_s22, %s32_s22 }
   0xb   :  { %p6738_p3 = scmp.ne.s32.totalorder %s32_s22, %s6737_s8  ;;  %p6743_p5 = scmp.lt.s32.totalorder %s6737_s8, %s6737_s8 }
   0xd   :  { %p6744_p6 = por %p6743_p5, %p6742_p4 }
   0xf   :  { %p6745_p7 = pnand %p6744_p6, %p6738_p3 }
  0x11   :  { %6748 = shalt.err (!%p6745_p7)
}
  0x12   :  { %s6823_s9 = smov 128   ;;  %s6824_s10 = smov 8  }
  0x13   :  { %37 = dma.hbm_to_vmem [thread:$0]  %s8145_s1, 512, %s32_s22, [#allocation7], %s6823_s9, %s6823_s9, %s6824_s10  }
  0x14   :  { %s6749_s15 = scalar_lea.hbm %s8144_s0, 1024 }
  0x15   :  { %p6750_p8 = scmp.ne.s32.totalorder %s8144_s0, %s6749_s15  ;;  %p6753_p9 = scmp.lt.u32.totalorder %s6749_s15, %s8144_s0 }
  0x17   :  { %p6755_p10 = pnand %p6753_p9, %p6750_p8 }
  0x19   :  { %6758 = shalt.err (!%p6755_p10)
}
  0x1a   :  { %s6759_s20 = scalar_lea.vmem %s6872_s24, 1024  ;;  %p6764_p12 = scmp.lt.s32.totalorder %s6872_s24, %s6872_s24 }
  0x1b   :  { %p6760_p11 = scmp.ne.s32.totalorder %s6872_s24, %s6759_s20  ;;  %p6765_p13 = scmp.lt.s32.totalorder %s6759_s20, %s6759_s20 }
  0x1d   :  { %p6766_p0 = por %p6765_p13, %p6764_p12 }
  0x1f   :  { %p6767_p1 = pnand %p6766_p0, %p6760_p11 }
  0x21   :  { %6770 = shalt.err (!%p6767_p1)
}
  0x22   :  { %25 = dma.hbm_to_vmem [thread:$0]  %s8144_s0, 1024, %s6872_s24, [#allocation4], %s6823_s9, %s6823_s9, %s6824_s10  }
  0x23   :  { %s6825_s22 = smov [#allocation8]   ;;  %s6771_s27 = scalar_lea.hbm %s8147_s3, 512 }
  0x24   :  { %s45_s23 = sshll.u32 %s6825_s22, 4  ;;  %p6772_p2 = scmp.ne.s32.totalorder %s8147_s3, %s6771_s27  ;;  %s46_s23 = int_to_ptr.vmem [resolvable:$true] %s45_s23 }
  0x25   :  { %p6775_p3 = scmp.lt.u32.totalorder %s6771_s27, %s8147_s3 }
  0x27   :  { %p6777_p4 = pnand %p6775_p3, %p6772_p2 }
  0x29   :  { %6780 = shalt.err (!%p6777_p4)
}
  0x2a   :  { %s6781_s8 = scalar_lea.vmem %s46_s23, 512  ;;  %p6786_p6 = scmp.lt.s32.totalorder %s46_s23, %s46_s23 }
  0x2b   :  { %p6782_p5 = scmp.ne.s32.totalorder %s46_s23, %s6781_s8  ;;  %p6787_p7 = scmp.lt.s32.totalorder %s6781_s8, %s6781_s8 }
  0x2d   :  { %p6788_p8 = por %p6787_p7, %p6786_p6 }
  0x2f   :  { %p6789_p9 = pnand %p6788_p8, %p6782_p5 }
  0x31   :  { %6792 = shalt.err (!%p6789_p9)
}
  0x32   :  { %51 = dma.hbm_to_vmem [thread:$0]  %s8147_s3, 512, %s46_s23, [#allocation7], %s6823_s9, %s6823_s9, %s6824_s10  }
  0x33   :  { %6815 = dma.done.wait [#allocation4], 1024  }
  0x34   :  { %6816 = vsyncadd [#allocation4], 4294966272 }
  0x35   :  { %6817 = dma.done.wait [#allocation7], 1024  }
  0x36   :  { %6818 = vsyncadd [#allocation7], 4294966272  ;;  %vm84_vm0 = vcmask 261120   ;;  %v73_v0 = vld [vmem:[#allocation6] sm:$0xff]  ;;  %v74_v1 = vld [vmem:[#allocation6 + $0x8] sm:$0xff]  ;;  %s6826_s11 = smov 112  }
  0x37   :  { %v75_v2 = vld [vmem:[#allocation6 + $0x10] sm:$0xff]  ;;  %v6567_v3 = vpack.c.bf16 %v74_v1, %v73_v0  ;;  %v76_v4 = vld [vmem:[#allocation6 + $0x18] sm:$0xff]  ;;  %v65_v5 = vld [vmem:[#allocation3] sm:$0xff]  ;;  %s6827_s12 = smov 120   ;;  %v8151_v31 = vmov 0.0   ;;  %vm6830_vm1 = vmmov 0  }
  0x38   :  { %v6571_v6 = vpack.c.bf16 %v76_v4, %v75_v2  ;;  %6215 = vmatprep.mubr.msk.f32.mxu0 %vm84_vm0, %v65_v5  ;;  %v66_v7 = vld [vmem:[#allocation3 + $0x8] sm:$0xff]  ;;  %v67_v8 = vld [vmem:[#allocation3 + $0x10] sm:$0xff]  ;;  %v68_v9 = vld [vmem:[#allocation3 + $0x18] sm:$0xff]  ;;  %6237 = vmatprep.subr.mxu1 %v8151_v31  ;;  %s6831_s13 = smov 96   ;;  %vm273_vm2 = vcmask 64512   ;;  %s6832_s14 = smov 64  }
  0x39   :  { %6568 = vmatprep.subr.bf16.mxu0 %v6567_v3  ;;  %v69_v10 = vld [vmem:[#allocation3 + $0x20] sm:$0xff]  ;;  %v70_v11 = vld [vmem:[#allocation3 + $0x28] sm:$0xff]  ;;  %v71_v12 = vld [vmem:[#allocation3 + $0x30] sm:$0xff]  ;;  %6239 = vmatprep.mubr.msk.f32.mxu1 %vm6830_vm1, %v8151_v31  ;;  %vm5528_vm3 = vcmask 130112   ;;  %vm5569_vm4 = vcmask 195712   ;;  %vm5610_vm5 = vcmask 261312  }
  0x3a   :  { %6570 = vmatpush3.bf16.msra.mxu0 %v6567_v3  ;;  %v72_v13 = vld [vmem:[#allocation3 + $0x38] sm:$0xff]  ;;  %v5941_v14 = vld [vmem:[%s8146_s2] ss:$0 sm:$0xff]  ;;  %s6829_s2 = smov 104   ;;  %vm5776_vm6 = vcmask 1041409   ;;  %vm5779_vm7 = vcmask 1042434  }
  0x3b   :  { %6572 = vmatprep.subr.bf16.mxu0 %v6571_v6  ;;  %vm5782_vm8 = vcmask 1043459   ;;  %vm5785_vm9 = vcmask 1044484   ;;  %vm5791_vm10 = vcmask 1046534   ;;  %vm5788_vm11 = vcmask 1045509   ;;  %s6836_s19 = smov [#allocation9]  }
  0x3c   :  { %vm5794_vm12 = vcmask 1047559   ;;  %vm5815_vm13 = vcmask 523520   ;;  %vm5834_vm14 = vcmask 785920   ;;  %vm5853_vm15 = vcmask 1048320   ;;  %s5931_s20 = sshll.u32 %s6836_s19, 4  ;;  %s5932_s20 = int_to_ptr.vmem [resolvable:$true] %s5931_s20 }
  0x3d   :  { %s6793_s1 = scalar_lea.vmem %s5932_s20, 256  ;;  %p6798_p11 = scmp.lt.s32.totalorder %s5932_s20, %s5932_s20 }
  0x3e   :  { %6574 = vmatpush3.bf16.msra.mxu0 %v6571_v6  ;;  %p6794_p10 = scmp.ne.s32.totalorder %s5932_s20, %s6793_s1  ;;  %p6799_p12 = scmp.lt.s32.totalorder %s6793_s1, %s6793_s1 }
  0x3f   :  { %6227 = vmatprep.subr.mxu0 %v8151_v31 }
  0x40   :  { %p6800_p13 = por %p6799_p12, %p6798_p11 }
  0x41   :  { %6216 = vmatmul.mubr.msk.f32.vlgmr.msra.gmra.mrb[0].mxu0 %vm84_vm0, %v66_v7 }
  0x42   :  { %6218 = vmatprep.mubr.msk.f32.mxu0 %vm84_vm0, %v67_v8  ;;  %p6801_p0 = pnand %p6800_p13, %p6794_p10 }
  0x45   :  { %6219 = vmatmul.mubr.msk.f32.gmra.mrb[2].mxu0 %vm84_vm0, %v68_v9 }
  0x46   :  { %6221 = vmatprep.mubr.msk.f32.mxu0 %vm84_vm0, %v69_v10 }
  0x49   :  { %6222 = vmatmul.mubr.msk.f32.gmra.mrb[4].mxu0 %vm84_vm0, %v70_v11 }
  0x4a   :  { %6224 = vmatprep.mubr.msk.f32.mxu0 %vm84_vm0, %v71_v12 }
  0x4d   :  { %6225 = vmatmul.mubr.msk.f32.gmra.mrb[6].mxu0 %vm84_vm0, %v72_v13 }
  0x4e   :  { %6229 = vmatprep.mubr.msk.f32.mxu0 %vm6830_vm1, %v8151_v31 }
 0x114   :  { %v6217_v15 = vpop.f32.mrb[0].mxu0 }
 0x115   :  { %v6935_v16 = vadd.f32 %v6217_v15, %v5941_v14  ;;  %v175_v17 = vpop.f32.mrb[1].mxu0 }
 0x116   :  { %v6940_v19 = vadd.f32 %v5941_v14, %v175_v17 }
 0x117   :  { %240 = vrot.lane.b32.xlu1 %v6935_v16, %s6826_s11  ;;  %224 = vrot.lane.b32.xlu0 %v6935_v16, %s6827_s12 }
 0x118   :  { %v6220_v18 = vpop.f32.mrb[2].mxu0 }
 0x119   :  { %v6942_v20 = vadd.f32 %v6220_v18, %v5941_v14  ;;  %v185_v21 = vpop.f32.mrb[3].mxu0 }
 0x11a   :  { %v6946_v23 = vadd.f32 %v5941_v14, %v185_v21 }
 0x11b   :  { %228 = vrot.lane.b32.xlu1 %v6942_v20, %s6827_s12  ;;  %222 = vrot.lane.b32.xlu0 %v6940_v19, %s6827_s12 }
 0x11c   :  { %v6223_v22 = vpop.f32.mrb[4].mxu0 }
 0x11d   :  { %v195_v24 = vpop.f32.mrb[5].mxu0  ;;  %v6948_v25 = vadd.f32 %v6223_v22, %v5941_v14 }
 0x11e   :  { %v6950_v26 = vadd.f32 %v5941_v14, %v195_v24 }
 0x11f   :  { %226 = vrot.lane.b32.xlu1 %v6946_v23, %s6827_s12  ;;  %238 = vrot.lane.b32.xlu0 %v6940_v19, %s6826_s11 }
 0x120   :  { %v6226_v27 = vpop.f32.mrb[6].mxu0 }
 0x121   :  { %v205_v28 = vpop.f32.mrb[7].mxu0  ;;  %v6955_v29 = vadd.f32 %v6226_v27, %v5941_v14 }
 0x122   :  { %v6959_v30 = vadd.f32 %v5941_v14, %v205_v28 }
 0x123   :  { %232 = vrot.lane.b32.xlu1 %v6948_v25, %s6827_s12  ;;  %230 = vrot.lane.b32.xlu0 %v6950_v26, %s6827_s12 }
 0x127   :  { %236 = vrot.lane.b32.xlu1 %v6955_v29, %s6827_s12  ;;  %234 = vrot.lane.b32.xlu0 %v6959_v30, %s6827_s12 }
 0x12b   :  { %244 = vrot.lane.b32.xlu1 %v6942_v20, %s6826_s11  ;;  %242 = vrot.lane.b32.xlu0 %v6946_v23, %s6826_s11 }
 0x12f   :  { %248 = vrot.lane.b32.xlu1 %v6948_v25, %s6826_s11  ;;  %246 = vrot.lane.b32.xlu0 %v6950_v26, %s6826_s11 }
 0x133   :  { %252 = vrot.lane.b32.xlu1 %v6955_v29, %s6826_s11  ;;  %254 = vrot.lane.b32.xlu0 %v6940_v19, %s6829_s2 }
 0x137   :  { %256 = vrot.lane.b32.xlu1 %v6935_v16, %s6829_s2  ;;  %250 = vrot.lane.b32.xlu0 %v6959_v30, %s6826_s11 }
 0x13b   :  { %260 = vrot.lane.b32.xlu1 %v6942_v20, %s6829_s2  ;;  %258 = vrot.lane.b32.xlu0 %v6946_v23, %s6829_s2 }
 0x13f   :  { %262 = vrot.lane.b32.xlu1 %v6950_v26, %s6829_s2  ;;  %271 = vrot.lane.b32.xlu0 %v6940_v19, %s6831_s13 }
 0x143   :  { %424 = vrot.lane.b32.xlu1 %v6946_v23, %s6831_s13  ;;  %264 = vrot.lane.b32.xlu0 %v6948_v25, %s6829_s2 }
 0x147   :  { %266 = vrot.lane.b32.xlu1 %v6959_v30, %s6829_s2  ;;  %348 = vrot.lane.b32.xlu0 %v6935_v16, %s6831_s13 }
 0x14b   :  { %500 = vrot.lane.b32.xlu1 %v6942_v20, %s6831_s13  ;;  %268 = vrot.lane.b32.xlu0 %v6955_v29, %s6829_s2 }
 0x14f   :  { %652 = vrot.lane.b32.xlu1 %v6948_v25, %s6831_s13  ;;  %576 = vrot.lane.b32.xlu0 %v6950_v26, %s6831_s13 }
 0x153   :  { %804 = vrot.lane.b32.xlu1 %v6955_v29, %s6831_s13  ;;  %728 = vrot.lane.b32.xlu0 %v6959_v30, %s6831_s13 }
 0x189   :  { %v7005_v32 = vpop.permute.xlu1 %240  ;;  %v7007_v33 = vpop.permute.xlu0 %224 }
 0x18a   :  { %956 = vrot.lane.b32.xlu1 %v7007_v33, %s6831_s13 }
 0x18d   :  { %v7011_v34 = vpop.permute.xlu1 %228  ;;  %v7013_v35 = vpop.permute.xlu0 %222 }
 0x18e   :  { %1108 = vrot.lane.b32.xlu1 %v7011_v34, %s6831_s13  ;;  %880 = vrot.lane.b32.xlu0 %v7013_v35, %s6831_s13 }
 0x191   :  { %v7019_v36 = vpop.permute.xlu1 %226  ;;  %v7021_v37 = vpop.permute.xlu0 %238 }
 0x192   :  { %1032 = vrot.lane.b32.xlu0 %v7019_v36, %s6831_s13 }
 0x195   :  { %v7025_v38 = vpop.permute.xlu1 %232  ;;  %v7027_v39 = vpop.permute.xlu0 %230 }
 0x196   :  { %1260 = vrot.lane.b32.xlu1 %v7025_v38, %s6831_s13  ;;  %1184 = vrot.lane.b32.xlu0 %v7027_v39, %s6831_s13 }
 0x199   :  { %v7033_v40 = vpop.permute.xlu1 %236  ;;  %v7035_v41 = vpop.permute.xlu0 %234 }
 0x19a   :  { %1412 = vrot.lane.b32.xlu1 %v7033_v40, %s6831_s13  ;;  %1336 = vrot.lane.b32.xlu0 %v7035_v41, %s6831_s13 }
 0x19d   :  { %v7041_v42 = vpop.permute.xlu1 %244  ;;  %v7043_v43 = vpop.permute.xlu0 %242 }
 0x19e   :  { %1564 = vrot.lane.b32.xlu1 %v7005_v32, %s6831_s13  ;;  %1488 = vrot.lane.b32.xlu0 %v7021_v37, %s6831_s13 }
 0x1a1   :  { %v7049_v44 = vpop.permute.xlu1 %248  ;;  %v7051_v45 = vpop.permute.xlu0 %246 }
 0x1a2   :  { %1716 = vrot.lane.b32.xlu1 %v7041_v42, %s6831_s13  ;;  %1640 = vrot.lane.b32.xlu0 %v7043_v43, %s6831_s13 }
 0x1a5   :  { %v7057_v46 = vpop.permute.xlu1 %252  ;;  %v7059_v47 = vpop.permute.xlu0 %254 }
 0x1a6   :  { %1868 = vrot.lane.b32.xlu1 %v7049_v44, %s6831_s13  ;;  %1792 = vrot.lane.b32.xlu0 %v7051_v45, %s6831_s13 }
 0x1a9   :  { %v7065_v48 = vpop.permute.xlu1 %256  ;;  %v7067_v49 = vpop.permute.xlu0 %250 }
 0x1aa   :  { %2020 = vrot.lane.b32.xlu1 %v7057_v46, %s6831_s13  ;;  %1944 = vrot.lane.b32.xlu0 %v7067_v49, %s6831_s13 }
 0x1ad   :  { %v7073_v50 = vpop.permute.xlu1 %260  ;;  %v7075_v51 = vpop.permute.xlu0 %258 }
 0x1ae   :  { %2172 = vrot.lane.b32.xlu1 %v7065_v48, %s6831_s13  ;;  %2096 = vrot.lane.b32.xlu0 %v7059_v47, %s6831_s13 }
 0x1b1   :  { %v7081_v52 = vpop.permute.xlu1 %262  ;;  %v272_v53 = vpop.permute.xlu0 %271 }
 0x1b2   :  { %2324 = vrot.lane.b32.xlu1 %v7073_v50, %s6831_s13  ;;  %2248 = vrot.lane.b32.xlu0 %v7075_v51, %s6831_s13 }
 0x1b3   :  { %6228 = vmatpush3.xpose.msk.msra.mxu0 %vm273_vm2, %v272_v53 }
 0x1b4   :  { %6232 = vmatprep.subr.mxu0 %v8151_v31 }
 0x1b5   :  { %v425_v54 = vpop.permute.xlu1 %424  ;;  %v7089_v55 = vpop.permute.xlu0 %264 }
 0x1b6   :  { %6230 = vmatmul.mubr.msk.f32.vlgmr.msra.gmra.mrb[8].mxu0 %vm273_vm2, %v6940_v19  ;;  %6238 = vmatpush3.xpose.msk.msra.mxu1 %vm273_vm2, %v425_v54 }
 0x1b7   :  { %2400 = vrot.lane.b32.xlu0 %v7081_v52, %s6831_s13  ;;  %2476 = vrot.lane.b32.xlu1 %v7089_v55, %s6831_s13 }
 0x1b8   :  { %6234 = vmatprep.mubr.msk.f32.mxu0 %vm6830_vm1, %v8151_v31  ;;  %6242 = vmatprep.subr.mxu1 %v8151_v31 }
 0x1b9   :  { %6240 = vmatmul.mubr.msk.f32.vlgmr.msra.gmra.mrb[0].mxu1 %vm273_vm2, %v6946_v23  ;;  %v7103_v56 = vpop.permute.xlu1 %266  ;;  %v349_v57 = vpop.permute.xlu0 %348 }
 0x1ba   :  { %6233 = vmatpush3.xpose.msk.msra.mxu0 %vm273_vm2, %v349_v57  ;;  %6244 = vmatprep.mubr.msk.f32.mxu1 %vm6830_vm1, %v8151_v31 }
 0x1bb   :  { %2552 = vrot.lane.b32.xlu0 %v7103_v56, %s6831_s13  ;;  %6252 = vmatprep.subr.mxu0 %v8151_v31 }
 0x1bd   :  { %v501_v58 = vpop.permute.xlu1 %500  ;;  %6235 = vmatmul.mubr.msk.f32.vlgmr.msra.gmra.mrb[10].mxu0 %vm273_vm2, %v6935_v16  ;;  %v7113_v59 = vpop.permute.xlu0 %268 }
 0x1be   :  { %6243 = vmatpush3.xpose.msk.msra.mxu1 %vm273_vm2, %v501_v58  ;;  %2628 = vrot.lane.b32.xlu1 %v7113_v59, %s6831_s13 }
 0x1bf   :  { %2992 = vrot.lane.b32.xlu0 %v6940_v19, %s6832_s14  ;;  %6247 = vmatprep.subr.mxu1 %v8151_v31 }
 0x1c0   :  { %6254 = vmatprep.mubr.msk.f32.mxu0 %vm6830_vm1, %v8151_v31 }
 0x1c1   :  { %6245 = vmatmul.mubr.msk.f32.vlgmr.msra.gmra.mrb[2].mxu1 %vm273_vm2, %v6942_v20  ;;  %v653_v60 = vpop.permute.xlu1 %652  ;;  %v577_v61 = vpop.permute.xlu0 %576 }
 0x1c2   :  { %6253 = vmatpush3.xpose.msk.msra.mxu0 %vm273_vm2, %v653_v60  ;;  %3068 = vrot.lane.b32.xlu1 %v6935_v16, %s6832_s14 }
 0x1c3   :  { %3220 = vrot.lane.b32.xlu0 %v6942_v20, %s6832_s14  ;;  %6248 = vmatpush3.xpose.msk.msra.mxu1 %vm273_vm2, %v577_v61 }
 0x1c4   :  { %6249 = vmatprep.mubr.msk.f32.mxu1 %vm6830_vm1, %v8151_v31  ;;  %6257 = vmatprep.subr.mxu1 %v8151_v31 }
 0x1c5   :  { %v805_v62 = vpop.permute.xlu1 %804  ;;  %6255 = vmatmul.mubr.msk.f32.vlgmr.msra.gmra.mrb[12].mxu0 %vm273_vm2, %v6948_v25  ;;  %6262 = vmatprep.subr.mxu0 %v8151_v31  ;;  %v729_v63 = vpop.permute.xlu0 %728 }
 0x1c6   :  { %6250 = vmatmul.mubr.msk.f32.vlgmr.msra.gmra.mrb[4].mxu1 %vm273_vm2, %v6950_v26  ;;  %6263 = vmatpush3.xpose.msk.msra.mxu0 %vm273_vm2, %v805_v62 }
 0x1c7   :  { %3448 = vrot.lane.b32.xlu0 %v6959_v30, %s6832_s14  ;;  %3144 = vrot.lane.b32.xlu1 %v6946_v23, %s6832_s14 }
 0x1c8   :  { %6258 = vmatpush3.xpose.msk.msra.mxu1 %vm273_vm2, %v729_v63  ;;  %6259 = vmatprep.mubr.msk.f32.mxu1 %vm6830_vm1, %v8151_v31 }
 0x1c9   :  { %6264 = vmatprep.mubr.msk.f32.mxu0 %vm6830_vm1, %v8151_v31  ;;  %6272 = vmatprep.subr.mxu0 %v8151_v31 }
 0x1ca   :  { %6265 = vmatmul.mubr.msk.f32.vlgmr.msra.gmra.mrb[14].mxu0 %vm273_vm2, %v6955_v29  ;;  %6267 = vmatprep.subr.mxu1 %v8151_v31 }
 0x1cb   :  { %6260 = vmatmul.mubr.msk.f32.vlgmr.msra.gmra.mrb[6].mxu1 %vm273_vm2, %v6959_v30  ;;  %3676 = vrot.lane.b32.xlu0 %v7007_v33, %s6832_s14 }
 0x1cc   :  { %3296 = vrot.lane.b32.xlu1 %v6950_v26, %s6832_s14  ;;  %6274 = vmatprep.mubr.msk.f32.mxu0 %vm6830_vm1, %v8151_v31  ;;  %v7354_v26 = vld [vmem:[%s8149_s5] sm:$0xff]  ;;  %s6833_s5 = smov 16  }
 0x1cd   :  { %6269 = vmatprep.mubr.msk.f32.mxu1 %vm6830_vm1, %v8151_v31 }
 0x1cf   :  { %3828 = vrot.lane.b32.xlu0 %v7011_v34, %s6832_s14 }
 0x1d0   :  { %3372 = vrot.lane.b32.xlu1 %v6948_v25, %s6832_s14 }
 0x1d3   :  { %3980 = vrot.lane.b32.xlu0 %v7025_v38, %s6832_s14 }
 0x1d4   :  { %3524 = vrot.lane.b32.xlu1 %v6955_v29, %s6832_s14 }
 0x1d7   :  { %4132 = vrot.lane.b32.xlu0 %v7033_v40, %s6832_s14 }
 0x1d8   :  { %3600 = vrot.lane.b32.xlu1 %v7013_v35, %s6832_s14 }
 0x1db   :  { %4284 = vrot.lane.b32.xlu0 %v7005_v32, %s6832_s14 }
 0x1dc   :  { %3752 = vrot.lane.b32.xlu1 %v7019_v36, %s6832_s14 }
 0x1df   :  { %4360 = vrot.lane.b32.xlu0 %v7043_v43, %s6832_s14 }
 0x1e0   :  { %3904 = vrot.lane.b32.xlu1 %v7027_v39, %s6832_s14 }
 0x1e3   :  { %4512 = vrot.lane.b32.xlu0 %v7051_v45, %s6832_s14 }
 0x1e4   :  { %4208 = vrot.lane.b32.xlu1 %v7021_v37, %s6832_s14 }
 0x1e7   :  { %4588 = vrot.lane.b32.xlu0 %v7049_v44, %s6832_s14 }
 0x1e8   :  { %4436 = vrot.lane.b32.xlu1 %v7041_v42, %s6832_s14 }
 0x1eb   :  { %4740 = vrot.lane.b32.xlu0 %v7057_v46, %s6832_s14 }
 0x1ec   :  { %4892 = vrot.lane.b32.xlu1 %v7065_v48, %s6832_s14 }
 0x1ef   :  { %4816 = vrot.lane.b32.xlu0 %v7059_v47, %s6832_s14 }
 0x1f0   :  { %5044 = vrot.lane.b32.xlu1 %v7073_v50, %s6832_s14 }
 0x1f3   :  { %4968 = vrot.lane.b32.xlu0 %v7075_v51, %s6832_s14 }
 0x1f4   :  { %4056 = vrot.lane.b32.xlu1 %v7035_v41, %s6832_s14 }
 0x1f7   :  { %4664 = vrot.lane.b32.xlu0 %v7067_v49, %s6832_s14 }
 0x1fc   :  { %v957_v0 = vpop.permute.xlu1 %956 }
 0x1fd   :  { %6273 = vmatpush3.xpose.msk.msra.mxu0 %vm273_vm2, %v957_v0 }
 0x1fe   :  { %6282 = vmatprep.subr.mxu0 %v8151_v31 }
 0x200   :  { %v1109_v1 = vpop.permute.xlu1 %1108  ;;  %6275 = vmatmul.mubr.msk.f32.vlgmr.msra.gmra.mrb[16].mxu0 %vm273_vm2, %v7007_v33  ;;  %v881_v2 = vpop.permute.xlu0 %880 }
 0x201   :  { %6268 = vmatpush3.xpose.msk.msra.mxu1 %vm273_vm2, %v881_v2  ;;  %6283 = vmatpush3.xpose.msk.msra.mxu0 %vm273_vm2, %v1109_v1 }
 0x202   :  { %6284 = vmatprep.mubr.msk.f32.mxu0 %vm6830_vm1, %v8151_v31  ;;  %6277 = vmatprep.subr.mxu1 %v8151_v31 }
 0x203   :  { %6292 = vmatprep.subr.mxu0 %v8151_v31 }
 0x204   :  { %6270 = vmatmul.mubr.msk.f32.vlgmr.msra.gmra.mrb[8].mxu1 %vm273_vm2, %v7013_v35  ;;  %6285 = vmatmul.mubr.msk.f32.vlgmr.msra.gmra.mrb[18].mxu0 %vm273_vm2, %v7011_v34  ;;  %v1033_v3 = vpop.permute.xlu0 %1032 }
 0x205   :  { %6278 = vmatpush3.xpose.msk.msra.mxu1 %vm273_vm2, %v1033_v3  ;;  %6279 = vmatprep.mubr.msk.f32.mxu1 %vm6830_vm1, %v8151_v31 }
 0x206   :  { %6287 = vmatprep.subr.mxu1 %v8151_v31  ;;  %6294 = vmatprep.mubr.msk.f32.mxu0 %vm6830_vm1, %v8151_v31 }
 0x208   :  { %v1261_v4 = vpop.permute.xlu1 %1260  ;;  %6280 = vmatmul.mubr.msk.f32.vlgmr.msra.gmra.mrb[10].mxu1 %vm273_vm2, %v7019_v36  ;;  %v1185_v5 = vpop.permute.xlu0 %1184 }
 0x209   :  { %6288 = vmatpush3.xpose.msk.msra.mxu1 %vm273_vm2, %v1185_v5  ;;  %6293 = vmatpush3.xpose.msk.msra.mxu0 %vm273_vm2, %v1261_v4 }
 0x20a   :  { %6289 = vmatprep.mubr.msk.f32.mxu1 %vm6830_vm1, %v8151_v31  ;;  %6297 = vmatprep.subr.mxu1 %v8151_v31 }
 0x20b   :  { %6302 = vmatprep.subr.mxu0 %v8151_v31 }
 0x20c   :  { %v1413_v6 = vpop.permute.xlu1 %1412  ;;  %6290 = vmatmul.mubr.msk.f32.vlgmr.msra.gmra.mrb[12].mxu1 %vm273_vm2, %v7027_v39  ;;  %6295 = vmatmul.mubr.msk.f32.vlgmr.msra.gmra.mrb[20].mxu0 %vm273_vm2, %v7025_v38  ;;  %v1337_v7 = vpop.permute.xlu0 %1336 }
 0x20d   :  { %6298 = vmatpush3.xpose.msk.msra.mxu1 %vm273_vm2, %v1337_v7  ;;  %6303 = vmatpush3.xpose.msk.msra.mxu0 %vm273_vm2, %v1413_v6 }
 0x20e   :  { %6299 = vmatprep.mubr.msk.f32.mxu1 %vm6830_vm1, %v8151_v31  ;;  %6304 = vmatprep.mubr.msk.f32.mxu0 %vm6830_vm1, %v8151_v31 }
 0x20f   :  { %6307 = vmatprep.subr.mxu1 %v8151_v31  ;;  %6312 = vmatprep.subr.mxu0 %v8151_v31 }
 0x210   :  { %v1565_v8 = vpop.permute.xlu1 %1564  ;;  %6300 = vmatmul.mubr.msk.f32.vlgmr.msra.gmra.mrb[14].mxu1 %vm273_vm2, %v7035_v41  ;;  %6305 = vmatmul.mubr.msk.f32.vlgmr.msra.gmra.mrb[22].mxu0 %vm273_vm2, %v7033_v40  ;;  %v1489_v9 = vpop.permute.xlu0 %1488 }
 0x211   :  { %6308 = vmatpush3.xpose.msk.msra.mxu1 %vm273_vm2, %v1489_v9  ;;  %6313 = vmatpush3.xpose.msk.msra.mxu0 %vm273_vm2, %v1565_v8 }
 0x212   :  { %6309 = vmatprep.mubr.msk.f32.mxu1 %vm6830_vm1, %v8151_v31  ;;  %6314 = vmatprep.mubr.msk.f32.mxu0 %vm6830_vm1, %v8151_v31 }
 0x213   :  { %6317 = vmatprep.subr.mxu1 %v8151_v31  ;;  %6322 = vmatprep.subr.mxu0 %v8151_v31 }
 0x214   :  { %v1717_v10 = vpop.permute.xlu1 %1716  ;;  %6310 = vmatmul.mubr.msk.f32.vlgmr.msra.gmra.mrb[16].mxu1 %vm273_vm2, %v7021_v37  ;;  %6315 = vmatmul.mubr.msk.f32.vlgmr.msra.gmra.mrb[24].mxu0 %vm273_vm2, %v7005_v32  ;;  %v1641_v11 = vpop.permute.xlu0 %1640 }
 0x215   :  { %6318 = vmatpush3.xpose.msk.msra.mxu1 %vm273_vm2, %v1641_v11  ;;  %6323 = vmatpush3.xpose.msk.msra.mxu0 %vm273_vm2, %v1717_v10 }
 0x216   :  { %6319 = vmatprep.mubr.msk.f32.mxu1 %vm6830_vm1, %v8151_v31  ;;  %6324 = vmatprep.mubr.msk.f32.mxu0 %vm6830_vm1, %v8151_v31 }
 0x217   :  { %6327 = vmatprep.subr.mxu1 %v8151_v31  ;;  %6332 = vmatprep.subr.mxu0 %v8151_v31 }
 0x218   :  { %v1869_v12 = vpop.permute.xlu1 %1868  ;;  %6320 = vmatmul.mubr.msk.f32.vlgmr.msra.gmra.mrb[18].mxu1 %vm273_vm2, %v7043_v43  ;;  %6325 = vmatmul.mubr.msk.f32.vlgmr.msra.gmra.mrb[26].mxu0 %vm273_vm2, %v7041_v42  ;;  %v1793_v13 = vpop.permute.xlu0 %1792 }
 0x219   :  { %6328 = vmatpush3.xpose.msk.msra.mxu1 %vm273_vm2, %v1793_v13  ;;  %6333 = vmatpush3.xpose.msk.msra.mxu0 %vm273_vm2, %v1869_v12 }
 0x21a   :  { %6329 = vmatprep.mubr.msk.f32.mxu1 %vm6830_vm1, %v8151_v31  ;;  %6334 = vmatprep.mubr.msk.f32.mxu0 %vm6830_vm1, %v8151_v31 }
 0x21b   :  { %6337 = vmatprep.subr.mxu1 %v8151_v31  ;;  %6342 = vmatprep.subr.mxu0 %v8151_v31 }
 0x21c   :  { %v2021_v14 = vpop.permute.xlu1 %2020  ;;  %6330 = vmatmul.mubr.msk.f32.vlgmr.msra.gmra.mrb[20].mxu1 %vm273_vm2, %v7051_v45  ;;  %6335 = vmatmul.mubr.msk.f32.vlgmr.msra.gmra.mrb[28].mxu0 %vm273_vm2, %v7049_v44  ;;  %v1945_v15 = vpop.permute.xlu0 %1944 }
 0x21d   :  { %6338 = vmatpush3.xpose.msk.msra.mxu1 %vm273_vm2, %v1945_v15  ;;  %6343 = vmatpush3.xpose.msk.msra.mxu0 %vm273_vm2, %v2021_v14 }
 0x21e   :  { %6339 = vmatprep.mubr.msk.f32.mxu1 %vm6830_vm1, %v8151_v31  ;;  %6344 = vmatprep.mubr.msk.f32.mxu0 %vm6830_vm1, %v8151_v31 }
 0x21f   :  { %6347 = vmatprep.subr.mxu1 %v8151_v31  ;;  %6352 = vmatprep.subr.mxu0 %v8151_v31 }
 0x220   :  { %v2173_v16 = vpop.permute.xlu1 %2172  ;;  %6340 = vmatmul.mubr.msk.f32.vlgmr.msra.gmra.mrb[22].mxu1 %vm273_vm2, %v7067_v49  ;;  %6345 = vmatmul.mubr.msk.f32.vlgmr.msra.gmra.mrb[30].mxu0 %vm273_vm2, %v7057_v46  ;;  %v2097_v17 = vpop.permute.xlu0 %2096 }
 0x221   :  { %6348 = vmatpush3.xpose.msk.msra.mxu1 %vm273_vm2, %v2097_v17  ;;  %6353 = vmatpush3.xpose.msk.msra.mxu0 %vm273_vm2, %v2173_v16 }
 0x222   :  { %6349 = vmatprep.mubr.msk.f32.mxu1 %vm6830_vm1, %v8151_v31  ;;  %6354 = vmatprep.mubr.msk.f32.mxu0 %vm6830_vm1, %v8151_v31 }
 0x223   :  { %6357 = vmatprep.subr.mxu1 %v8151_v31  ;;  %6362 = vmatprep.subr.mxu0 %v8151_v31 }
 0x224   :  { %v2325_v18 = vpop.permute.xlu1 %2324  ;;  %6350 = vmatmul.mubr.msk.f32.vlgmr.msra.gmra.mrb[24].mxu1 %vm273_vm2, %v7059_v47  ;;  %6355 = vmatmul.mubr.msk.f32.vlgmr.msra.gmra.mrb[32].mxu0 %vm273_vm2, %v7065_v48  ;;  %v2249_v19 = vpop.permute.xlu0 %2248 }
 0x225   :  { %6358 = vmatpush3.xpose.msk.msra.mxu1 %vm273_vm2, %v2249_v19  ;;  %6363 = vmatpush3.xpose.msk.msra.mxu0 %vm273_vm2, %v2325_v18 }
 0x226   :  { %6359 = vmatprep.mubr.msk.f32.mxu1 %vm6830_vm1, %v8151_v31  ;;  %6364 = vmatprep.mubr.msk.f32.mxu0 %vm6830_vm1, %v8151_v31 }
 0x227   :  { %6367 = vmatprep.subr.mxu1 %v8151_v31  ;;  %6372 = vmatprep.subr.mxu0 %v8151_v31 }
 0x228   :  { %6360 = vmatmul.mubr.msk.f32.vlgmr.msra.gmra.mrb[26].mxu1 %vm273_vm2, %v7075_v51  ;;  %6365 = vmatmul.mubr.msk.f32.vlgmr.msra.gmra.mrb[34].mxu0 %vm273_vm2, %v7073_v50 }
 0x229   :  { %v2477_v20 = vpop.permute.xlu1 %2476  ;;  %v2401_v21 = vpop.permute.xlu0 %2400  ;;  %6369 = vmatprep.mubr.msk.f32.mxu1 %vm6830_vm1, %v8151_v31  ;;  %6374 = vmatprep.mubr.msk.f32.mxu0 %vm6830_vm1, %v8151_v31 }
 0x22a   :  { %6368 = vmatpush3.xpose.msk.msra.mxu1 %vm273_vm2, %v2401_v21  ;;  %6373 = vmatpush3.xpose.msk.msra.mxu0 %vm273_vm2, %v2477_v20 }
 0x22b   :  { %6377 = vmatprep.subr.mxu1 %v8151_v31  ;;  %6382 = vmatprep.subr.mxu0 %v8151_v31 }
 0x22d   :  { %6370 = vmatmul.mubr.msk.f32.vlgmr.msra.gmra.mrb[28].mxu1 %vm273_vm2, %v7081_v52  ;;  %6375 = vmatmul.mubr.msk.f32.vlgmr.msra.gmra.mrb[36].mxu0 %vm273_vm2, %v7089_v55  ;;  %v2553_v22 = vpop.permute.xlu0 %2552 }
 0x22e   :  { %6378 = vmatpush3.xpose.msk.msra.mxu1 %vm273_vm2, %v2553_v22  ;;  %6379 = vmatprep.mubr.msk.f32.mxu1 %vm6830_vm1, %v8151_v31 }
 0x22f   :  { %6387 = vmatprep.subr.mxu1 %v8151_v31  ;;  %6384 = vmatprep.mubr.msk.f32.mxu0 %vm6830_vm1, %v8151_v31 }
 0x230   :  { %v2629_v23 = vpop.permute.xlu1 %2628 }
 0x231   :  { %6380 = vmatmul.mubr.msk.f32.vlgmr.msra.gmra.mrb[30].mxu1 %vm273_vm2, %v7103_v56  ;;  %v2993_v24 = vpop.permute.xlu0 %2992  ;;  %6383 = vmatpush3.xpose.msk.msra.mxu0 %vm273_vm2, %v2629_v23 }
 0x232   :  { %6388 = vmatpush3.msra.mxu1 %v2993_v24  ;;  %6392 = vmatprep.subr.mxu0 %v8151_v31 }
 0x233   :  { %6389 = vmatprep.mubr.msk.f32.mxu1 %vm6830_vm1, %v8151_v31  ;;  %6397 = vmatprep.subr.mxu1 %v8151_v31 }
 0x234   :  { %6385 = vmatmul.mubr.msk.f32.vlgmr.msra.gmra.mrb[38].mxu0 %vm273_vm2, %v7113_v59  ;;  %v3069_v25 = vpop.permute.xlu1 %3068 }
 0x235   :  { %6393 = vmatpush3.msra.mxu0 %v3069_v25  ;;  %6394 = vmatprep.mubr.msk.f32.mxu0 %vm6830_vm1, %v8151_v31  ;;  %v7396_v0 = vpop.permute.xlu0 %3220 }
 0x236   :  { %6402 = vmatprep.subr.mxu0 %v8151_v31 }
 0x239   :  { %v7398_v1 = vpop.permute.xlu0 %3448  ;;  %v7407_v7 = vpop.permute.xlu1 %3144 }
 0x23d   :  { %v7400_v2 = vpop.permute.xlu0 %3676 }
 0x23e   :  { %v7423_v19 = vpop.permute.xlu1 %3296 }
 0x241   :  { %v7402_v3 = vpop.permute.xlu0 %3828 }
 0x245   :  { %v7409_v8 = vpop.permute.xlu0 %3980 }
 0x249   :  { %v7428_v22 = vpop.permute.xlu0 %4132 }
 0x289   :  { %v344_v27 = vpop.f32.mrb[8].mxu0 }
 0x28a   :  { %v7357_v28 = vadd.f32 %v344_v27, %v7354_v26  ;;  %v6231_v29 = vpop.f32.mrb[9].mxu0 }
 0x28c   :  { %v496_v30 = vpop.f32.mrb[0].mxu1  ;;  %v2704_v32 = vsel %vm273_vm2, %v7357_v28, -inf }
 0x28d   :  { %v7362_v33 = vadd.f32 %v496_v30, %v7354_v26  ;;  %2705 = vmax.xlane.f32.xlu0 %v2704_v32  ;;  %v6241_v34 = vpop.f32.mrb[1].mxu1 }
 0x28e   :  { %v7438_v34 = vpop.permute.xlu1 %3372 }
 0x28f   :  { %v2710_v35 = vsel %vm273_vm2, %v7362_v33, -inf }
 0x290   :  { %v420_v36 = vpop.f32.mrb[10].mxu0 }
 0x291   :  { %2711 = vmax.xlane.f32.xlu0 %v2710_v35  ;;  %v7367_v37 = vadd.f32 %v420_v36, %v7354_v26  ;;  %v6236_v38 = vpop.f32.mrb[11].mxu0 }
 0x293   :  { %v2707_v39 = vsel %vm273_vm2, %v7367_v37, -inf }
 0x294   :  { %v572_v40 = vpop.f32.mrb[2].mxu1  ;;  %2708 = vmax.xlane.f32.xlu1 %v2707_v39 }
 0x295   :  { %v7372_v41 = vadd.f32 %v572_v40, %v7354_v26  ;;  %v6246_v42 = vpop.f32.mrb[3].mxu1 }
 0x297   :  { %v2713_v43 = vsel %vm273_vm2, %v7372_v41, -inf }
 0x298   :  { %2714 = vmax.xlane.f32.xlu0 %v2713_v43  ;;  %v724_v44 = vpop.f32.mrb[12].mxu0 }
 0x299   :  { %v648_v45 = vpop.f32.mrb[4].mxu1  ;;  %v7377_v46 = vadd.f32 %v724_v44, %v7354_v26  ;;  %v6256_v47 = vpop.f32.mrb[13].mxu0 }
 0x29a   :  { %v7380_v48 = vadd.f32 %v648_v45, %v7354_v26  ;;  %v6251_v49 = vpop.f32.mrb[5].mxu1  ;;  %v7447_v44 = vpop.permute.xlu0 %4284 }
 0x29b   :  { %v2719_v50 = vsel %vm273_vm2, %v7377_v46, -inf }
 0x29c   :  { %2720 = vmax.xlane.f32.xlu0 %v2719_v50  ;;  %v2716_v51 = vsel %vm273_vm2, %v7380_v48, -inf }
 0x29d   :  { %v876_v53 = vpop.f32.mrb[14].mxu0  ;;  %2717 = vmax.xlane.f32.xlu1 %v2716_v51 }
 0x29e   :  { %v7387_v54 = vadd.f32 %v876_v53, %v7354_v26  ;;  %v800_v57 = vpop.f32.mrb[6].mxu1  ;;  %v6266_v58 = vpop.f32.mrb[15].mxu0 }
 0x29f   :  { %v7390_v60 = vadd.f32 %v800_v57, %v7354_v26  ;;  %v6261_v61 = vpop.f32.mrb[7].mxu1  ;;  %v7457_v58 = vpop.permute.xlu1 %3524 }
 0x2a0   :  { %v2725_v62 = vsel %vm273_vm2, %v7387_v54, -inf }
 0x2a1   :  { %2726 = vmax.xlane.f32.xlu0 %v2725_v62  ;;  %v2722_v63 = vsel %vm273_vm2, %v7390_v60, -inf }
 0x2a2   :  { %2723 = vmax.xlane.f32.xlu1 %v2722_v63 }
 0x2d3   :  { %v1028_v4 = vpop.f32.mrb[16].mxu0 }
 0x2d4   :  { %v7405_v5 = vadd.f32 %v1028_v4, %v7354_v26  ;;  %v6276_v6 = vpop.f32.mrb[17].mxu0 }
 0x2d6   :  { %v2731_v9 = vsel %vm273_vm2, %v7405_v5, -inf }
 0x2d7   :  { %2732 = vmax.xlane.f32.xlu0 %v2731_v9  ;;  %v952_v10 = vpop.f32.mrb[8].mxu1  ;;  %v1180_v11 = vpop.f32.mrb[18].mxu0 }
 0x2d8   :  { %v7414_v12 = vadd.f32 %v952_v10, %v7354_v26  ;;  %v7417_v13 = vadd.f32 %v1180_v11, %v7354_v26  ;;  %v6271_v14 = vpop.f32.mrb[9].mxu1  ;;  %v6286_v15 = vpop.f32.mrb[19].mxu0 }
 0x2d9   :  { %v7466_v11 = vpop.permute.xlu0 %4360 }
 0x2da   :  { %v2737_v16 = vsel %vm273_vm2, %v7417_v13, -inf  ;;  %v2728_v17 = vsel %vm273_vm2, %v7414_v12, -inf }
 0x2db   :  { %2738 = vmax.xlane.f32.xlu0 %v2737_v16  ;;  %2729 = vmax.xlane.f32.xlu1 %v2728_v17  ;;  %v1104_v18 = vpop.f32.mrb[10].mxu1 }
 0x2dc   :  { %v7426_v20 = vadd.f32 %v1104_v18, %v7354_v26  ;;  %v6281_v21 = vpop.f32.mrb[11].mxu1 }
 0x2dd   :  { %v7472_v21 = vpop.permute.xlu1 %3600 }
 0x2de   :  { %v2734_v23 = vsel %vm273_vm2, %v7426_v20, -inf }
 0x2df   :  { %v1332_v24 = vpop.f32.mrb[20].mxu0  ;;  %2735 = vmax.xlane.f32.xlu1 %v2734_v23  ;;  %v1256_v25 = vpop.f32.mrb[12].mxu1 }
 0x2e0   :  { %v7433_v27 = vadd.f32 %v1332_v24, %v7354_v26  ;;  %v7436_v29 = vadd.f32 %v1256_v25, %v7354_v26  ;;  %v6291_v30 = vpop.f32.mrb[13].mxu1  ;;  %v6296_v32 = vpop.f32.mrb[21].mxu0 }
 0x2e1   :  { %v7476_v32 = vpop.permute.xlu0 %4512 }
 0x2e2   :  { %v2743_v35 = vsel %vm273_vm2, %v7433_v27, -inf  ;;  %v2740_v36 = vsel %vm273_vm2, %v7436_v29, -inf  ;;  %8153 = vst [vmem:[#allocation13_spill] sm:$0xff] %v7476_v32 }
 0x2e3   :  { %2744 = vmax.xlane.f32.xlu0 %v2743_v35  ;;  %v1484_v38 = vpop.f32.mrb[22].mxu0  ;;  %2741 = vmax.xlane.f32.xlu1 %v2740_v36  ;;  %v1408_v39 = vpop.f32.mrb[14].mxu1 }
 0x2e4   :  { %v7445_v40 = vadd.f32 %v1484_v38, %v7354_v26  ;;  %v6301_v42 = vpop.f32.mrb[15].mxu1  ;;  %v6306_v43 = vpop.f32.mrb[23].mxu0  ;;  %v7450_v45 = vadd.f32 %v1408_v39, %v7354_v26 }
 0x2e5   :  { %v7480_v42 = vpop.permute.xlu1 %3752 }
 0x2e6   :  { %v2749_v47 = vsel %vm273_vm2, %v7445_v40, -inf  ;;  %v2746_v62 = vsel %vm273_vm2, %v7450_v45, -inf }
 0x2e7   :  { %v1636_v49 = vpop.f32.mrb[24].mxu0  ;;  %2750 = vmax.xlane.f32.xlu1 %v2749_v47  ;;  %v1560_v50 = vpop.f32.mrb[16].mxu1 }
 0x2e8   :  { %v7455_v51 = vadd.f32 %v1560_v50, %v7354_v26  ;;  %v6311_v53 = vpop.f32.mrb[17].mxu1  ;;  %v6316_v57 = vpop.f32.mrb[25].mxu0  ;;  %v7460_v61 = vadd.f32 %v1636_v49, %v7354_v26 }
 0x2e9   :  { %v7484_v53 = vpop.permute.xlu0 %4588  ;;  %v7486_v57 = vpop.permute.xlu1 %3904 }
 0x2ea   :  { %v2752_v63 = vsel %vm273_vm2, %v7455_v51, -inf  ;;  %v2755_v14 = vsel %vm273_vm2, %v7460_v61, -inf }
 0x2eb   :  { %v1788_v4 = vpop.f32.mrb[26].mxu0  ;;  %2747 = vmax.xlane.f32.xlu1 %v2746_v62  ;;  %2753 = vmax.xlane.f32.xlu0 %v2752_v63  ;;  %v1712_v6 = vpop.f32.mrb[18].mxu1 }
 0x2ec   :  { %v6321_v9 = vpop.f32.mrb[19].mxu1  ;;  %v6326_v10 = vpop.f32.mrb[27].mxu0  ;;  %v7515_v31 = vadd.f32 %v1788_v4, %v7354_v26 }
 0x2ef   :  { %v1940_v15 = vpop.f32.mrb[28].mxu0  ;;  %2756 = vmax.xlane.f32.xlu1 %v2755_v14  ;;  %v7470_v16 = vpop.f32.mrb[20].mxu1 }
 0x2f0   :  { %v6331_v17 = vpop.f32.mrb[21].mxu1  ;;  %v6336_v18 = vpop.f32.mrb[29].mxu0 }
 0x2f1   :  { %v7494_v14 = vpop.permute.xlu0 %4740  ;;  %v7498_v18 = vpop.permute.xlu1 %4208 }
 0x2f2   :  { %8154 = vst [vmem:[#allocation14_spill] sm:$0xff] %v7494_v14 }
 0x2f3   :  { %v2016_v23 = vpop.f32.mrb[22].mxu1  ;;  %v7474_v24 = vpop.f32.mrb[30].mxu0 }
 0x2f4   :  { %v6341_v25 = vpop.f32.mrb[23].mxu1  ;;  %v6346_v30 = vpop.f32.mrb[31].mxu0 }
 0x2f7   :  { %v2168_v35 = vpop.f32.mrb[24].mxu1  ;;  %v7478_v36 = vpop.f32.mrb[32].mxu0 }
 0x2f8   :  { %v6351_v38 = vpop.f32.mrb[25].mxu1  ;;  %v6356_v39 = vpop.f32.mrb[33].mxu0 }
 0x2f9   :  { %v7502_v39 = vpop.permute.xlu0 %4816 }
 0x2fa   :  { %8155 = vst [vmem:[#allocation15_spill] sm:$0xff] %v7502_v39  ;;  %v7521_v39 = vadd.f32 %v1712_v6, %v7354_v26  ;;  %v7533_v6 = vadd.f32 %v1940_v15, %v7354_v26 }
 0x2fb   :  { %v2320_v43 = vpop.f32.mrb[26].mxu1  ;;  %v7482_v47 = vpop.f32.mrb[34].mxu0 }
 0x2fc   :  { %v6361_v49 = vpop.f32.mrb[27].mxu1  ;;  %v6366_v50 = vpop.f32.mrb[35].mxu0  ;;  %v7546_v15 = vadd.f32 %v2320_v43, %v7354_v26 }
 0x2fd   :  { %v7504_v49 = vpop.permute.xlu1 %4436 }
 0x300   :  { %v2472_v62 = vpop.f32.mrb[28].mxu1  ;;  %v7488_v63 = vpop.f32.mrb[36].mxu0  ;;  %5196 = vrot.lane.b32.xlu1 %v7089_v55, %s6832_s14 }
 0x301   :  { %v6376_v9 = vpop.f32.mrb[37].mxu0  ;;  %v6371_v10 = vpop.f32.mrb[29].mxu1  ;;  %5120 = vrot.lane.b32.xlu0 %v7081_v52, %s6832_s14 }
 0x302   :  { %v7506_v55 = vpop.permute.xlu0 %4968  ;;  %v7508_v50 = vpop.permute.xlu1 %4892 }
 0x303   :  { %8156 = vst [vmem:[#allocation16_spill] sm:$0xff] %v7506_v55  ;;  %8157 = vst [vmem:[#allocation17_spill] sm:$0xff] %v7508_v50  ;;  %v7524_v55 = vadd.f32 %v2016_v23, %v7354_v26  ;;  %v7536_v23 = vadd.f32 %v2168_v35, %v7354_v26  ;;  %v2767_v35 = vsel %vm273_vm2, %v7533_v6, -inf }
 0x304   :  { %v7496_v17 = vpop.f32.mrb[30].mxu1 }
 0x305   :  { %v6381_v25 = vpop.f32.mrb[31].mxu1 }
 0x306   :  { %v7510_v9 = vpop.permute.xlu0 %4664  ;;  %v7512_v52 = vpop.permute.xlu1 %5044 }
 0x307   :  { %v7500_v30 = vpop.f32.mrb[38].mxu0  ;;  %8158 = vst [vmem:[#allocation18_spill] sm:$0xff] %v7510_v9  ;;  %8159 = vst [vmem:[#allocation19_spill] sm:$0xff] %v7512_v52  ;;  %v2761_v52 = vsel %vm273_vm2, %v7515_v31, -inf }
 0x308   :  { %v6386_v38 = vpop.f32.mrb[39].mxu0 }
 0x30a   :  { %v7518_v14 = vpop.permute.xlu1 %4056 }
 0x31a   :  { %v2706_v10 = vpop.xlane.xlu0 %2705 }
 0x31b   :  { %v2800_v25 = vsub.f32 %v7357_v28, %v2706_v10  ;;  %v2758_v10 = vsel %vm273_vm2, %v7521_v39, -inf }
 0x31d   :  { %v2832_v38 = vmul.f32 1.442695, %v2800_v25 }
 0x31e   :  { %v2712_v32 = vpop.xlane.xlu0 %2711 }
 0x31f   :  { %6599 = vpow2.f32 %v2832_v38  ;;  %v2802_v50 = vsub.f32 %v7362_v33, %v2712_v32  ;;  %v2770_v33 = vsel %vm273_vm2, %v7524_v55, -inf }
 0x320   :  { %2762 = vmax.xlane.f32.xlu0 %v2761_v52  ;;  %v2776_v52 = vsel %vm273_vm2, %v7536_v23, -inf }
 0x321   :  { %v2836_v4 = vmul.f32 1.442695, %v2802_v50  ;;  %v2709_v9 = vpop.xlane.xlu1 %2708 }
 0x322   :  { %v2801_v28 = vsub.f32 %v7367_v37, %v2709_v9  ;;  %v7543_v9 = vadd.f32 %v7470_v16, %v7354_v26 }
 0x323   :  { %6601 = vpow2.f32 %v2836_v4 }
 0x324   :  { %v2834_v32 = vmul.f32 1.442695, %v2801_v28  ;;  %2759 = vmax.xlane.f32.xlu1 %v2758_v10  ;;  %2771 = vmax.xlane.f32.xlu0 %v2770_v33  ;;  %v7562_v28 = vadd.f32 %v2472_v62, %v7354_v26  ;;  %v2764_v33 = vsel %vm273_vm2, %v7543_v9, -inf }
 0x325   :  { %v2715_v50 = vpop.xlane.xlu0 %2714 }
 0x326   :  { %6603 = vpow2.f32 %v2834_v32  ;;  %v2803_v37 = vsub.f32 %v7372_v41, %v2715_v50  ;;  %v7556_v41 = vadd.f32 %v7474_v24, %v7354_v26  ;;  %v2782_v24 = vsel %vm273_vm2, %v7546_v15, -inf }
 0x327   :  { %v8160_v32 = vmov 0.0  }
 0x328   :  { %v2838_v25 = vmul.f32 1.442695, %v2803_v37  ;;  %2768 = vmax.xlane.f32.xlu1 %v2767_v35  ;;  %2777 = vmax.xlane.f32.xlu0 %v2776_v52  ;;  %v2773_v37 = vsel %vm273_vm2, %v7556_v41, -inf  ;;  %v7585_v35 = vadd.f32 %v7496_v17, %v7354_v26 }
 0x329   :  { %v7552_v38 = vpop.eup %6599  ;;  %v2721_v4 = vpop.xlane.xlu0 %2720 }
 0x32a   :  { %6605 = vpow2.f32 %v2838_v25  ;;  %v2718_v16 = vpop.xlane.xlu1 %2717  ;;  %6390 = vmatmul.mubr.msk.f32.vlgmr.msra.gmra.mrb[32].mxu1 %vm273_vm2, %v7552_v38  ;;  %v2805_v43 = vsub.f32 %v7377_v46, %v2721_v4 }
 0x32b   :  { %v2804_v10 = vsub.f32 %v7380_v48, %v2718_v16  ;;  %6398 = vmatpush3.msra.mxu1 %v7407_v7  ;;  %6399 = vmatprep.mubr.msk.f32.mxu1 %vm6830_vm1, %v8160_v32  ;;  %v7577_v48 = vadd.f32 %v7478_v36, %v7354_v26  ;;  %v2788_v36 = vsel %vm273_vm2, %v7562_v28, -inf }
 0x32c   :  { %v2842_v50 = vmul.f32 1.442695, %v2805_v43  ;;  %2765 = vmax.xlane.f32.xlu1 %v2764_v33  ;;  %2783 = vmax.xlane.f32.xlu0 %v2782_v24  ;;  %v2794_v43 = vsel %vm273_vm2, %v7585_v35, -inf }
 0x32d   :  { %v7572_v46 = vpop.eup %6601  ;;  %v2840_v62 = vmul.f32 1.442695, %v2804_v10  ;;  %6407 = vmatprep.subr.mxu1 %v8160_v32 }
 0x32e   :  { %6607 = vpow2.f32 %v2842_v50  ;;  %6400 = vmatmul.mubr.msk.f32.vlgmr.msra.gmra.mrb[34].mxu1 %vm273_vm2, %v7572_v46  ;;  %v2727_v7 = vpop.xlane.xlu0 %2726 }
 0x32f   :  { %6609 = vpow2.f32 %v2840_v62  ;;  %v2724_v52 = vpop.xlane.xlu1 %2723  ;;  %6408 = vmatpush3.msra.mxu1 %v7423_v19  ;;  %v2807_v25 = vsub.f32 %v7387_v54, %v2727_v7  ;;  %6409 = vmatprep.mubr.msk.f32.mxu1 %vm6830_vm1, %v8160_v32  ;;  %v7604_v54 = vadd.f32 %v7482_v47, %v7354_v26 }
 0x330   :  { %v7593_v4 = vpop.eup %6603  ;;  %v2806_v16 = vsub.f32 %v7390_v60, %v2724_v52  ;;  %2774 = vmax.xlane.f32.xlu1 %v2773_v37  ;;  %2789 = vmax.xlane.f32.xlu0 %v2788_v36  ;;  %v2779_v60 = vsel %vm273_vm2, %v7577_v48, -inf }
 0x331   :  { %v2846_v17 = vmul.f32 1.442695, %v2807_v25  ;;  %6395 = vmatmul.mubr.msk.f32.vlgmr.msra.gmra.mrb[40].mxu0 %vm273_vm2, %v7593_v4  ;;  %6417 = vmatprep.subr.mxu1 %v8160_v32  ;;  %v2785_v47 = vsel %vm273_vm2, %v7604_v54, -inf }
 0x332   :  { %v2844_v19 = vmul.f32 1.442695, %v2806_v16  ;;  %6403 = vmatpush3.msra.mxu0 %v7396_v0  ;;  %6404 = vmatprep.mubr.msk.f32.mxu0 %vm6830_vm1, %v8160_v32  ;;  %v7620_v0 = vadd.f32 %v7488_v63, %v7354_v26 }
 0x333   :  { %6611 = vpow2.f32 %v2846_v17  ;;  %6412 = vmatprep.subr.mxu0 %v8160_v32 }
 0x334   :  { %v7611_v10 = vpop.eup %6605  ;;  %6613 = vpow2.f32 %v2844_v19  ;;  %2780 = vmax.xlane.f32.xlu1 %v2779_v60  ;;  %2795 = vmax.xlane.f32.xlu0 %v2794_v43  ;;  %v2791_v63 = vsel %vm273_vm2, %v7620_v0, -inf }
 0x335   :  { %6405 = vmatmul.mubr.msk.f32.vlgmr.msra.gmra.mrb[42].mxu0 %vm273_vm2, %v7611_v10 }
 0x336   :  { %6413 = vmatpush3.msra.mxu0 %v7438_v34  ;;  %6414 = vmatprep.mubr.msk.f32.mxu0 %vm6830_vm1, %v8160_v32  ;;  %v7636_v34 = vadd.f32 %v7500_v30, %v7354_v26 }
 0x337   :  { %6422 = vmatprep.subr.mxu0 %v8160_v32 }
 0x338   :  { %v7625_v33 = vpop.eup %6607  ;;  %2786 = vmax.xlane.f32.xlu1 %v2785_v47 }
 0x339   :  { %v7627_v24 = vpop.eup %6609  ;;  %6415 = vmatmul.mubr.msk.f32.vlgmr.msra.gmra.mrb[44].mxu0 %vm273_vm2, %v7625_v33 }
 0x33a   :  { %6410 = vmatmul.mubr.msk.f32.vlgmr.msra.gmra.mrb[36].mxu1 %vm273_vm2, %v7627_v24  ;;  %6423 = vmatpush3.msra.mxu0 %v7457_v58 }
 0x33b   :  { %6418 = vmatpush3.msra.mxu1 %v7398_v1  ;;  %6419 = vmatprep.mubr.msk.f32.mxu1 %vm6830_vm1, %v8160_v32  ;;  %v2797_v1 = vsel %vm273_vm2, %v7636_v34, -inf }
 0x33c   :  { %2792 = vmax.xlane.f32.xlu1 %v2791_v63  ;;  %6424 = vmatprep.mubr.msk.f32.mxu0 %vm6830_vm1, %v8160_v32 }
 0x33d   :  { %v7645_v50 = vpop.eup %6611  ;;  %6427 = vmatprep.subr.mxu1 %v8160_v32  ;;  %6432 = vmatprep.subr.mxu0 %v8160_v32 }
 0x33e   :  { %v7649_v26 = vpop.eup %6613  ;;  %6425 = vmatmul.mubr.msk.f32.vlgmr.msra.gmra.mrb[46].mxu0 %vm273_vm2, %v7645_v50 }
 0x33f   :  { %6420 = vmatmul.mubr.msk.f32.vlgmr.msra.gmra.mrb[38].mxu1 %vm273_vm2, %v7649_v26  ;;  %6433 = vmatpush3.msra.mxu0 %v7400_v2 }
 0x340   :  { %6428 = vmatpush3.msra.mxu1 %v7472_v21  ;;  %2798 = vmax.xlane.f32.xlu1 %v2797_v1 }
 0x341   :  { %6434 = vmatprep.mubr.msk.f32.mxu0 %vm6830_vm1, %v8160_v32  ;;  %6442 = vmatprep.subr.mxu0 %v8160_v32 }
 0x342   :  { %6429 = vmatprep.mubr.msk.f32.mxu1 %vm6830_vm1, %v8160_v32  ;;  %6437 = vmatprep.subr.mxu1 %v8160_v32 }
 0x34a   :  { %5272 = vrot.lane.b32.xlu0 %v7103_v56, %s6832_s14 }
 0x351   :  { %5348 = vrot.lane.b32.xlu1 %v7113_v59, %s6832_s14 }
 0x364   :  { %v2733_v2 = vpop.xlane.xlu0 %2732 }
 0x365   :  { %v2809_v58 = vsub.f32 %v7405_v5, %v2733_v2 }
 0x367   :  { %v2850_v21 = vmul.f32 1.442695, %v2809_v58 }
 0x368   :  { %v2730_v30 = vpop.xlane.xlu1 %2729  ;;  %v2739_v62 = vpop.xlane.xlu0 %2738 }
 0x369   :  { %6615 = vpow2.f32 %v2850_v21  ;;  %v2808_v7 = vsub.f32 %v7414_v12, %v2730_v30  ;;  %v2811_v37 = vsub.f32 %v7417_v13, %v2739_v62  ;;  %v2896_v13 = vsel %vm273_vm2, %v7552_v38, 0.0 }
 0x36b   :  { %v2848_v52 = vmul.f32 1.442695, %v2808_v7  ;;  %v2854_v25 = vmul.f32 1.442695, %v2811_v37 }
 0x36c   :  { %v2736_v36 = vpop.xlane.xlu1 %2735 }
 0x36d   :  { %6617 = vpow2.f32 %v2848_v52  ;;  %v2810_v56 = vsub.f32 %v7426_v20, %v2736_v36 }
 0x36e   :  { %6619 = vpow2.f32 %v2854_v25 }
 0x36f   :  { %v2852_v16 = vmul.f32 1.442695, %v2810_v56 }
 0x370   :  { %v2742_v59 = vpop.xlane.xlu1 %2741  ;;  %v2745_v17 = vpop.xlane.xlu0 %2744 }
 0x371   :  { %6621 = vpow2.f32 %v2852_v16  ;;  %v2812_v5 = vsub.f32 %v7436_v29, %v2742_v59  ;;  %v2813_v19 = vsub.f32 %v7433_v27, %v2745_v17 }
 0x373   :  { %v6616_v60 = vpop.eup %6615  ;;  %v2856_v43 = vmul.f32 1.442695, %v2812_v5  ;;  %v2858_v12 = vmul.f32 1.442695, %v2813_v19 }
 0x374   :  { %v2751_v47 = vpop.xlane.xlu1 %2750  ;;  %6435 = vmatmul.mubr.msk.f32.vlgmr.msra.gmra.mrb[48].mxu0 %vm273_vm2, %v6616_v60  ;;  %v2923_v58 = vsel %vm273_vm2, %v6616_v60, 0.0 }
 0x375   :  { %6623 = vpow2.f32 %v2856_v43  ;;  %v2815_v20 = vsub.f32 %v7445_v40, %v2751_v47  ;;  %6443 = vmatpush3.msra.mxu0 %v7402_v3  ;;  %2897 = vadd.xlane.f32.xlu1 %v2896_v13 }
 0x376   :  { %6625 = vpow2.f32 %v2858_v12  ;;  %6444 = vmatprep.mubr.msk.f32.mxu0 %vm6830_vm1, %v8160_v32  ;;  %6452 = vmatprep.subr.mxu0 %v8160_v32 }
 0x377   :  { %v6618_v27 = vpop.eup %6617  ;;  %v2862_v29 = vmul.f32 1.442695, %v2815_v20 }
 0x378   :  { %v6620_v63 = vpop.eup %6619  ;;  %v2748_v1 = vpop.xlane.xlu1 %2747  ;;  %6430 = vmatmul.mubr.msk.f32.vlgmr.msra.gmra.mrb[40].mxu1 %vm273_vm2, %v6618_v27  ;;  %v2920_v38 = vsel %vm273_vm2, %v6618_v27, 0.0 }
 0x379   :  { %v2754_v2 = vpop.xlane.xlu0 %2753  ;;  %6627 = vpow2.f32 %v2862_v29  ;;  %v2814_v40 = vsub.f32 %v7450_v45, %v2748_v1  ;;  %6438 = vmatpush3.msra.mxu1 %v7480_v42  ;;  %6445 = vmatmul.mubr.msk.f32.vlgmr.msra.gmra.mrb[50].mxu0 %vm273_vm2, %v6620_v63 }
 0x37a   :  { %v2816_v3 = vsub.f32 %v7455_v51, %v2754_v2  ;;  %6453 = vmatpush3.msra.mxu0 %v7409_v8  ;;  %2921 = vadd.xlane.f32.xlu0 %v2920_v38  ;;  %v2929_v51 = vsel %vm273_vm2, %v6620_v63, 0.0 }
 0x37b   :  { %v6622_v21 = vpop.eup %6621  ;;  %v2860_v30 = vmul.f32 1.442695, %v2814_v40  ;;  %2924 = vadd.xlane.f32.xlu1 %v2923_v58  ;;  %6439 = vmatprep.mubr.msk.f32.mxu1 %vm6830_vm1, %v8160_v32 }
 0x37c   :  { %v2864_v62 = vmul.f32 1.442695, %v2816_v3  ;;  %6447 = vmatprep.subr.mxu1 %v8160_v32  ;;  %v2757_v45 = vpop.xlane.xlu1 %2756  ;;  %6440 = vmatmul.mubr.msk.f32.vlgmr.msra.gmra.mrb[42].mxu1 %vm273_vm2, %v6622_v21  ;;  %v2926_v42 = vsel %vm273_vm2, %v6622_v21, 0.0 }
 0x37d   :  { %6629 = vpow2.f32 %v2860_v30  ;;  %v2817_v8 = vsub.f32 %v7460_v61, %v2757_v45  ;;  %6448 = vmatpush3.msra.mxu1 %v7486_v57  ;;  %6449 = vmatprep.mubr.msk.f32.mxu1 %vm6830_vm1, %v8160_v32  ;;  %v7741_v59 = vpop.permute.xlu0 %5120 }
 0x37e   :  { %2930 = vadd.xlane.f32.xlu0 %v2929_v51  ;;  %6454 = vmatprep.mubr.msk.f32.mxu0 %vm6830_vm1, %v8160_v32  ;;  %6631 = vpow2.f32 %v2864_v62  ;;  %v8161_v62 = vld [vmem:[#allocation13_spill] sm:$0xff] }
 0x37f   :  { %v6624_v7 = vpop.eup %6623  ;;  %v2866_v37 = vmul.f32 1.442695, %v2817_v8  ;;  %2927 = vadd.xlane.f32.xlu1 %v2926_v42  ;;  %6457 = vmatprep.subr.mxu1 %v8160_v32 }
 0x380   :  { %v6626_v52 = vpop.eup %6625  ;;  %6462 = vmatprep.subr.mxu0 %v8160_v32  ;;  %6450 = vmatmul.mubr.msk.f32.vlgmr.msra.gmra.mrb[44].mxu1 %vm273_vm2, %v6624_v7  ;;  %v2932_v61 = vsel %vm273_vm2, %v6624_v7, 0.0  ;;  %v7743_v17 = vpop.permute.xlu1 %5196 }
 0x381   :  { %6633 = vpow2.f32 %v2866_v37  ;;  %6455 = vmatmul.mubr.msk.f32.vlgmr.msra.gmra.mrb[52].mxu0 %vm273_vm2, %v6626_v52  ;;  %6458 = vmatpush3.msra.mxu1 %v7518_v14  ;;  %v2935_v57 = vsel %vm273_vm2, %v6626_v52, 0.0  ;;  %v8162_v37 = vld [vmem:[#allocation14_spill] sm:$0xff] }
 0x382   :  { %6463 = vmatpush3.msra.mxu0 %v7428_v22  ;;  %2936 = vadd.xlane.f32.xlu0 %v2935_v57 }
 0x383   :  { %v6628_v25 = vpop.eup %6627  ;;  %2933 = vadd.xlane.f32.xlu1 %v2932_v61  ;;  %6464 = vmatprep.mubr.msk.f32.mxu0 %vm6830_vm1, %v8160_v32 }
 0x384   :  { %6472 = vmatprep.subr.mxu0 %v8160_v32  ;;  %v2941_v36 = vsel %vm273_vm2, %v6628_v25, 0.0  ;;  %6459 = vmatprep.mubr.msk.f32.mxu1 %vm6830_vm1, %v8160_v32 }
 0x385   :  { %6465 = vmatmul.mubr.msk.f32.vlgmr.msra.gmra.mrb[54].mxu0 %vm273_vm2, %v6628_v25  ;;  %6467 = vmatprep.subr.mxu1 %v8160_v32 }
 0x386   :  { %6473 = vmatpush3.msra.mxu0 %v7447_v44  ;;  %2942 = vadd.xlane.f32.xlu0 %v2941_v36 }
 0x387   :  { %v6630_v22 = vpop.eup %6629  ;;  %6474 = vmatprep.mubr.msk.f32.mxu0 %vm6830_vm1, %v8160_v32  ;;  %6482 = vmatprep.subr.mxu0 %v8160_v32 }
 0x388   :  { %6460 = vmatmul.mubr.msk.f32.vlgmr.msra.gmra.mrb[46].mxu1 %vm273_vm2, %v6630_v22  ;;  %v2938_v14 = vsel %vm273_vm2, %v6630_v22, 0.0  ;;  %v6632_v56 = vpop.eup %6631 }
 0x389   :  { %6468 = vmatpush3.msra.mxu1 %v7498_v18  ;;  %2939 = vadd.xlane.f32.xlu1 %v2938_v14  ;;  %v2944_v18 = vsel %vm273_vm2, %v6632_v56, 0.0  ;;  %v8163_v14 = vld [vmem:[#allocation18_spill] sm:$0xff] }
 0x38a   :  { %6469 = vmatprep.mubr.msk.f32.mxu1 %vm6830_vm1, %v8160_v32  ;;  %6477 = vmatprep.subr.mxu1 %v8160_v32 }
 0x38b   :  { %v6634_v44 = vpop.eup %6633 }
 0x38c   :  { %6470 = vmatmul.mubr.msk.f32.vlgmr.msra.gmra.mrb[48].mxu1 %vm273_vm2, %v6632_v56  ;;  %6475 = vmatmul.mubr.msk.f32.vlgmr.msra.gmra.mrb[56].mxu0 %vm273_vm2, %v6634_v44  ;;  %v2947_v16 = vsel %vm273_vm2, %v6634_v44, 0.0 }
 0x38d   :  { %6478 = vmatpush3.msra.mxu1 %v7466_v11  ;;  %6483 = vmatpush3.msra.mxu0 %v7504_v49 }
 0x38e   :  { %2948 = vadd.xlane.f32.xlu0 %v2947_v16  ;;  %6484 = vmatprep.mubr.msk.f32.mxu0 %vm6830_vm1, %v8160_v32 }
 0x38f   :  { %6492 = vmatprep.subr.mxu0 %v8160_v32  ;;  %6479 = vmatprep.mubr.msk.f32.mxu1 %vm6830_vm1, %v8160_v32 }
 0x390   :  { %6487 = vmatprep.subr.mxu1 %v8160_v32 }
 0x392   :  { %2945 = vadd.xlane.f32.xlu0 %v2944_v18 }
 0x3ad   :  { %v2763_v11 = vpop.xlane.xlu0 %2762 }
 0x3ae   :  { %v2819_v49 = vsub.f32 %v7515_v31, %v2763_v11 }
 0x3b0   :  { %v2870_v5 = vmul.f32 1.442695, %v2819_v49 }
 0x3b1   :  { %v2760_v19 = vpop.xlane.xlu1 %2759  ;;  %v2772_v43 = vpop.xlane.xlu0 %2771 }
 0x3b2   :  { %6635 = vpow2.f32 %v2870_v5  ;;  %v2818_v60 = vsub.f32 %v7521_v39, %v2760_v19  ;;  %v2822_v29 = vsub.f32 %v7524_v55, %v2772_v43  ;;  %v8164_v5 = vld [vmem:[#allocation15_spill] sm:$0xff]  ;;  %v8165_v19 = vld [vmem:[#allocation17_spill] sm:$0xff] }
 0x3b4   :  { %v2868_v12 = vmul.f32 1.442695, %v2818_v60  ;;  %v2876_v38 = vmul.f32 1.442695, %v2822_v29 }
 0x3b5   :  { %v2769_v47 = vpop.xlane.xlu1 %2768  ;;  %v2778_v27 = vpop.xlane.xlu0 %2777 }
 0x3b6   :  { %6637 = vpow2.f32 %v2868_v12  ;;  %v2821_v13 = vsub.f32 %v7533_v6, %v2769_v47  ;;  %v2824_v40 = vsub.f32 %v7536_v23, %v2778_v27 }
 0x3b8   :  { %v2874_v20 = vmul.f32 1.442695, %v2821_v13  ;;  %v2880_v23 = vmul.f32 1.442695, %v2824_v40  ;;  %v8166_v13 = vld [vmem:[#allocation16_spill] sm:$0xff] }
 0x3b9   :  { %v2766_v63 = vpop.xlane.xlu1 %2765  ;;  %v2784_v6 = vpop.xlane.xlu0 %2783 }
 0x3ba   :  { %6639 = vpow2.f32 %v2874_v20  ;;  %v2820_v1 = vsub.f32 %v7543_v9, %v2766_v63  ;;  %v8167_v20 = vld [vmem:[#allocation19_spill] sm:$0xff] }
 0x3bc   :  { %v6636_v31 = vpop.eup %6635  ;;  %v2872_v2 = vmul.f32 1.442695, %v2820_v1 }
 0x3bd   :  { %v2775_v39 = vpop.xlane.xlu1 %2774  ;;  %6485 = vmatmul.mubr.msk.f32.vlgmr.msra.gmra.mrb[58].mxu0 %vm273_vm2, %v6636_v31  ;;  %v2953_v3 = vsel %vm273_vm2, %v6636_v31, 0.0  ;;  %v2790_v42 = vpop.xlane.xlu0 %2789 }
 0x3be   :  { %6641 = vpow2.f32 %v2872_v2  ;;  %v2823_v58 = vsub.f32 %v7556_v41, %v2775_v39  ;;  %6493 = vmatpush3.msra.mxu0 %v7484_v53  ;;  %2954 = vadd.xlane.f32.xlu0 %v2953_v3  ;;  %v2826_v53 = vsub.f32 %v7546_v15, %v2784_v6  ;;  %v2828_v61 = vsub.f32 %v7562_v28, %v2790_v42 }
 0x3bf   :  { %6494 = vmatprep.mubr.msk.f32.mxu0 %vm6830_vm1, %v8160_v32  ;;  %6502 = vmatprep.subr.mxu0 %v8160_v32  ;;  %6643 = vpow2.f32 %v2876_v38 }
 0x3c0   :  { %v6638_v55 = vpop.eup %6637  ;;  %v2878_v9 = vmul.f32 1.442695, %v2823_v58  ;;  %v2884_v15 = vmul.f32 1.442695, %v2826_v53  ;;  %v2888_v44 = vmul.f32 1.442695, %v2828_v61 }
 0x3c1   :  { %v2781_v21 = vpop.xlane.xlu1 %2780  ;;  %6480 = vmatmul.mubr.msk.f32.vlgmr.msra.gmra.mrb[50].mxu1 %vm273_vm2, %v6638_v55  ;;  %v2950_v30 = vsel %vm273_vm2, %v6638_v55, 0.0  ;;  %v2796_v22 = vpop.xlane.xlu0 %2795  ;;  %v2902_v55 = vsel %vm273_vm2, %v7572_v46, 0.0  ;;  %v2911_v46 = vsel %vm273_vm2, %v7625_v33, 0.0 }
 0x3c2   :  { %6645 = vpow2.f32 %v2878_v9  ;;  %v2825_v41 = vsub.f32 %v7577_v48, %v2781_v21  ;;  %6488 = vmatpush3.msra.mxu1 %v8161_v62  ;;  %2951 = vadd.xlane.f32.xlu1 %v2950_v30  ;;  %v2830_v18 = vsub.f32 %v7585_v35, %v2796_v22  ;;  %v2899_v9 = vsel %vm273_vm2, %v7593_v4, 0.0 }
 0x3c3   :  { %6489 = vmatprep.mubr.msk.f32.mxu1 %vm6830_vm1, %v8160_v32  ;;  %6497 = vmatprep.subr.mxu1 %v8160_v32  ;;  %6647 = vpow2.f32 %v2880_v23  ;;  %v2908_v23 = vsel %vm273_vm2, %v7627_v24, 0.0  ;;  %v2914_v30 = vsel %vm273_vm2, %v7649_v26, 0.0  ;;  %v2917_v4 = vsel %vm273_vm2, %v7645_v50, 0.0 }
 0x3c4   :  { %v6640_v45 = vpop.eup %6639  ;;  %v2882_v8 = vmul.f32 1.442695, %v2825_v41  ;;  %v2892_v47 = vmul.f32 1.442695, %v2830_v18 }
 0x3c5   :  { %v2787_v51 = vpop.xlane.xlu1 %2786  ;;  %6495 = vmatmul.mubr.msk.f32.vlgmr.msra.gmra.mrb[60].mxu0 %vm273_vm2, %v6640_v45  ;;  %v2959_v7 = vsel %vm273_vm2, %v6640_v45, 0.0  ;;  %v5273_v39 = vpop.permute.xlu0 %5272 }
 0x3c6   :  { %6649 = vpow2.f32 %v2882_v8  ;;  %v2827_v48 = vsub.f32 %v7604_v54, %v2787_v51  ;;  %6503 = vmatpush3.msra.mxu0 %v8162_v37  ;;  %2960 = vadd.xlane.f32.xlu0 %v2959_v7 }
 0x3c7   :  { %6504 = vmatprep.mubr.msk.f32.mxu0 %vm6830_vm1, %v8160_v32  ;;  %6512 = vmatprep.subr.mxu0 %v8160_v32 }
 0x3c8   :  { %v6642_v52 = vpop.eup %6641  ;;  %v2886_v57 = vmul.f32 1.442695, %v2827_v48 }
 0x3c9   :  { %v2793_v25 = vpop.xlane.xlu1 %2792  ;;  %6490 = vmatmul.mubr.msk.f32.vlgmr.msra.gmra.mrb[52].mxu1 %vm273_vm2, %v6642_v52  ;;  %v2956_v36 = vsel %vm273_vm2, %v6642_v52, 0.0  ;;  %v6644_v56 = vpop.eup %6643 }
 0x3ca   :  { %6651 = vpow2.f32 %v2886_v57  ;;  %v2829_v54 = vsub.f32 %v7620_v0, %v2793_v25  ;;  %6498 = vmatpush3.msra.mxu1 %v8163_v14  ;;  %2957 = vadd.xlane.f32.xlu1 %v2956_v36  ;;  %v2962_v60 = vsel %vm273_vm2, %v6644_v56, 0.0 }
 0x3cb   :  { %6653 = vpow2.f32 %v2884_v15  ;;  %6499 = vmatprep.mubr.msk.f32.mxu1 %vm6830_vm1, %v8160_v32  ;;  %6507 = vmatprep.subr.mxu1 %v8160_v32 }
 0x3cc   :  { %v6646_v28 = vpop.eup %6645  ;;  %v2890_v16 = vmul.f32 1.442695, %v2829_v54 }
 0x3cd   :  { %v2799_v11 = vpop.xlane.xlu1 %2798  ;;  %6500 = vmatmul.mubr.msk.f32.vlgmr.msra.gmra.mrb[54].mxu1 %vm273_vm2, %v6644_v56  ;;  %6505 = vmatmul.mubr.msk.f32.vlgmr.msra.gmra.mrb[62].mxu0 %vm273_vm2, %v6646_v28  ;;  %v2965_v0 = vsel %vm273_vm2, %v6646_v28, 0.0  ;;  %v6648_v43 = vpop.eup %6647 }
 0x3ce   :  { %6655 = vpow2.f32 %v2890_v16  ;;  %v2831_v49 = vsub.f32 %v7636_v34, %v2799_v11  ;;  %6508 = vmatpush3.msra.mxu1 %v8164_v5  ;;  %6513 = vmatpush3.msra.mxu0 %v8165_v19  ;;  %v2968_v27 = vsel %vm273_vm2, %v6648_v43, 0.0 }
 0x3cf   :  { %2966 = vadd.xlane.f32.xlu0 %v2965_v0  ;;  %2963 = vadd.xlane.f32.xlu1 %v2962_v60  ;;  %6657 = vpow2.f32 %v2888_v44 }
 0x3d0   :  { %v6650_v35 = vpop.eup %6649  ;;  %v2894_v12 = vmul.f32 1.442695, %v2831_v49  ;;  %6509 = vmatprep.mubr.msk.f32.mxu1 %vm6830_vm1, %v8160_v32  ;;  %6514 = vmatprep.mubr.msk.f32.mxu0 %vm6830_vm1, %v8160_v32 }
 0x3d1   :  { %6517 = vmatprep.subr.mxu1 %v8160_v32  ;;  %6522 = vmatprep.subr.mxu0 %v8160_v32  ;;  %v2971_v34 = vsel %vm273_vm2, %v6650_v35, 0.0 }
 0x3d2   :  { %6659 = vpow2.f32 %v2894_v12  ;;  %6510 = vmatmul.mubr.msk.f32.vlgmr.msra.gmra.mrb[56].mxu1 %vm273_vm2, %v6648_v43  ;;  %6515 = vmatmul.mubr.msk.f32.vlgmr.msra.gmra.mrb[64].mxu0 %vm273_vm2, %v6650_v35 }
 0x3d3   :  { %6518 = vmatpush3.msra.mxu1 %v8166_v13  ;;  %6523 = vmatpush3.msra.mxu0 %v8167_v20  ;;  %6661 = vpow2.f32 %v2892_v47 }
 0x3d4   :  { %v6652_v29 = vpop.eup %6651  ;;  %2972 = vadd.xlane.f32.xlu0 %v2971_v34  ;;  %2969 = vadd.xlane.f32.xlu1 %v2968_v27 }
 0x3d5   :  { %v6654_v63 = vpop.eup %6653  ;;  %6519 = vmatprep.mubr.msk.f32.mxu1 %vm6830_vm1, %v8160_v32  ;;  %6524 = vmatprep.mubr.msk.f32.mxu0 %vm6830_vm1, %v8160_v32  ;;  %v2977_v1 = vsel %vm273_vm2, %v6652_v29, 0.0 }
 0x3d6   :  { %6527 = vmatprep.subr.mxu1 %v8160_v32  ;;  %6532 = vmatprep.subr.mxu0 %v8160_v32  ;;  %v2974_v2 = vsel %vm273_vm2, %v6654_v63, 0.0 }
 0x3d7   :  { %6520 = vmatmul.mubr.msk.f32.vlgmr.msra.gmra.mrb[58].mxu1 %vm273_vm2, %v6654_v63  ;;  %6525 = vmatmul.mubr.msk.f32.vlgmr.msra.gmra.mrb[66].mxu0 %vm273_vm2, %v6652_v29 }
 0x3d8   :  { %v6656_v31 = vpop.eup %6655  ;;  %6528 = vmatpush3.msra.mxu1 %v7741_v59  ;;  %6533 = vmatpush3.msra.mxu0 %v7743_v17  ;;  %v5349_v17 = vpop.permute.xlu1 %5348 }
 0x3d9   :  { %2978 = vadd.xlane.f32.xlu0 %v2977_v1  ;;  %2975 = vadd.xlane.f32.xlu1 %v2974_v2  ;;  %v6658_v38 = vpop.eup %6657  ;;  %v2983_v40 = vsel %vm273_vm2, %v6656_v31, 0.0 }
 0x3da   :  { %6529 = vmatprep.mubr.msk.f32.mxu1 %vm6830_vm1, %v8160_v32  ;;  %6534 = vmatprep.mubr.msk.f32.mxu0 %vm6830_vm1, %v8160_v32  ;;  %v2980_v3 = vsel %vm273_vm2, %v6658_v38, 0.0 }
 0x3db   :  { %6537 = vmatprep.subr.mxu1 %v8160_v32  ;;  %6542 = vmatprep.subr.mxu0 %v8160_v32 }
 0x3dc   :  { %v6660_v59 = vpop.eup %6659  ;;  %6530 = vmatmul.mubr.msk.f32.vlgmr.msra.gmra.mrb[60].mxu1 %vm273_vm2, %v6658_v38  ;;  %6535 = vmatmul.mubr.msk.f32.vlgmr.msra.gmra.mrb[68].mxu0 %vm273_vm2, %v6656_v31 }
 0x3dd   :  { %6538 = vmatpush3.msra.mxu1 %v5273_v39  ;;  %6543 = vmatpush3.msra.mxu0 %v5349_v17  ;;  %v6662_v6 = vpop.eup %6661  ;;  %v2989_v58 = vsel %vm273_vm2, %v6660_v59, 0.0 }
 0x3de   :  { %2984 = vadd.xlane.f32.xlu0 %v2983_v40  ;;  %2981 = vadd.xlane.f32.xlu1 %v2980_v3  ;;  %v2986_v21 = vsel %vm273_vm2, %v6662_v6, 0.0 }
 0x3df   :  { %6539 = vmatprep.mubr.msk.f32.mxu1 %vm6830_vm1, %v8160_v32  ;;  %6544 = vmatprep.mubr.msk.f32.mxu0 %vm6830_vm1, %v8160_v32  ;;  %v2905_v32 = vsel %vm273_vm2, %v7611_v10, 0.0 }
 0x3e0   :  { %6540 = vmatmul.mubr.msk.f32.vlgmr.msra.gmra.mrb[62].mxu1 %vm273_vm2, %v6662_v6  ;;  %6545 = vmatmul.mubr.msk.f32.vlgmr.msra.gmra.mrb[70].mxu0 %vm273_vm2, %v6660_v59 }
 0x3e2   :  { %2990 = vadd.xlane.f32.xlu0 %v2989_v58  ;;  %2903 = vadd.xlane.f32.xlu1 %v2902_v55 }
 0x3e6   :  { %2900 = vadd.xlane.f32.xlu0 %v2899_v9  ;;  %2909 = vadd.xlane.f32.xlu1 %v2908_v23 }
 0x3ea   :  { %2906 = vadd.xlane.f32.xlu0 %v2905_v32  ;;  %2987 = vadd.xlane.f32.xlu1 %v2986_v21 }
 0x3ee   :  { %2912 = vadd.xlane.f32.xlu0 %v2911_v46  ;;  %2915 = vadd.xlane.f32.xlu1 %v2914_v30 }
 0x3f2   :  { %2918 = vadd.xlane.f32.xlu0 %v2917_v4 }
 0x3fd   :  { %v3064_v24 = vpop.f32.mrb[32].mxu1 }
 0x3fe   :  { %v6391_v41 = vpop.f32.mrb[33].mxu1 }
 0x401   :  { %v7845_v62 = vpop.f32.mrb[34].mxu1 }
 0x402   :  { %v6401_v10 = vpop.f32.mrb[35].mxu1  ;;  %v2898_v53 = vpop.xlane.xlu1 %2897 }
 0x403   :  { %6663 = vrcp.f32 %v2898_v53 }
 0x404   :  { %v7847_v45 = vpop.f32.mrb[40].mxu0 }
 0x405   :  { %v6396_v42 = vpop.f32.mrb[41].mxu0 }
 0x407   :  { %v2922_v25 = vpop.xlane.xlu0 %2921 }
 0x408   :  { %v7849_v33 = vpop.f32.mrb[42].mxu0  ;;  %v2925_v22 = vpop.xlane.xlu1 %2924 }
 0x409   :  { %v6406_v8 = vpop.f32.mrb[43].mxu0  ;;  %6665 = vrcp.f32 %v2925_v22 }
 0x40a   :  { %6667 = vrcp.f32 %v2922_v25 }
 0x40b   :  { %v2931_v36 = vpop.xlane.xlu0 %2930 }
 0x40c   :  { %v7851_v26 = vpop.f32.mrb[44].mxu0  ;;  %v2928_v14 = vpop.xlane.xlu1 %2927  ;;  %6669 = vrcp.f32 %v2931_v36 }
 0x40d   :  { %v6664_v51 = vpop.eup %6663  ;;  %v7853_v7 = vpop.f32.mrb[36].mxu1  ;;  %6671 = vrcp.f32 %v2928_v14 }
 0x40e   :  { %v6416_v50 = vpop.f32.mrb[45].mxu0  ;;  %v5425_v48 = vmul.f32 %v6664_v51, %v3064_v24  ;;  %v6411_v37 = vpop.f32.mrb[37].mxu1 }
 0x40f   :  { %v2937_v54 = vpop.xlane.xlu0 %2936 }
 0x410   :  { %5488 = vst.msk [vmem:[#allocation2] sm:$0xff] %vm273_vm2, %v5425_v48  ;;  %v2934_v28 = vpop.xlane.xlu1 %2933 }
 0x411   :  { %v7856_v15 = vpop.f32.mrb[46].mxu0  ;;  %6673 = vrcp.f32 %v2934_v28 }
 0x412   :  { %v7858_v52 = vpop.f32.mrb[38].mxu1  ;;  %v6426_v61 = vpop.f32.mrb[47].mxu0  ;;  %6675 = vrcp.f32 %v2937_v54 }
 0x413   :  { %v6421_v57 = vpop.f32.mrb[39].mxu1  ;;  %v2943_v56 = vpop.xlane.xlu0 %2942 }
 0x414   :  { %v6666_v44 = vpop.eup %6665  ;;  %6677 = vrcp.f32 %v2943_v56 }
 0x415   :  { %v6668_v49 = vpop.eup %6667 }
 0x416   :  { %v6670_v12 = vpop.eup %6669  ;;  %v2940_v47 = vpop.xlane.xlu1 %2939 }
 0x417   :  { %v6672_v13 = vpop.eup %6671  ;;  %6679 = vrcp.f32 %v2940_v47 }
 0x41b   :  { %v2949_v18 = vpop.xlane.xlu0 %2948  ;;  %v6674_v31 = vpop.eup %6673 }
 0x41c   :  { %v6676_v40 = vpop.eup %6675  ;;  %6681 = vrcp.f32 %v2949_v18 }
 0x41e   :  { %v6678_v55 = vpop.eup %6677 }
 0x41f   :  { %v2946_v34 = vpop.xlane.xlu0 %2945 }
 0x420   :  { %6683 = vrcp.f32 %v2946_v34 }
 0x421   :  { %v6680_v46 = vpop.eup %6679 }
 0x426   :  { %v6682_v53 = vpop.eup %6681 }
 0x42a   :  { %v6684_v57 = vpop.eup %6683 }
 0x447   :  { %v3748_v16 = vpop.f32.mrb[48].mxu0 }
 0x448   :  { %v5443_v11 = vmul.f32 %v6666_v44, %v3748_v16  ;;  %v6436_v0 = vpop.f32.mrb[49].mxu0 }
 0x44a   :  { %5506 = vrot.lane.b32.xlu0 %v5443_v11, %s6824_s10 }
 0x44b   :  { %v3672_v5 = vpop.f32.mrb[40].mxu1  ;;  %v7862_v1 = vpop.xlane.xlu0 %2954 }
 0x44c   :  { %v5441_v19 = vmul.f32 %v6668_v49, %v3672_v5  ;;  %v3900_v60 = vpop.f32.mrb[50].mxu0  ;;  %v6431_v43 = vpop.f32.mrb[41].mxu1 }
 0x44d   :  { %v6446_v35 = vpop.f32.mrb[51].mxu0  ;;  %v5447_v27 = vmul.f32 %v6670_v12, %v3900_v60 }
 0x44e   :  { %5504 = vrot.lane.b32.xlu1 %v5441_v19, %s6824_s10 }
 0x44f   :  { %v3824_v20 = vpop.f32.mrb[42].mxu1  ;;  %v7866_v2 = vpop.xlane.xlu1 %2951 }
 0x450   :  { %v5445_v29 = vmul.f32 %v6672_v13, %v3824_v20  ;;  %v6441_v63 = vpop.f32.mrb[43].mxu1 }
 0x452   :  { %5508 = vrot.lane.b32.xlu0 %v5445_v29, %s6824_s10  ;;  %5510 = vrot.lane.b32.xlu1 %v5447_v27, %s6824_s10 }
 0x453   :  { %v3976_v38 = vpop.f32.mrb[44].mxu1  ;;  %v7872_v9 = vpop.xlane.xlu0 %2960 }
 0x454   :  { %v5449_v59 = vmul.f32 %v6674_v31, %v3976_v38  ;;  %v4052_v39 = vpop.f32.mrb[52].mxu0  ;;  %v6451_v17 = vpop.f32.mrb[45].mxu1 }
 0x455   :  { %v5451_v3 = vmul.f32 %v6676_v40, %v4052_v39  ;;  %v6456_v6 = vpop.f32.mrb[53].mxu0  ;;  %v5627_v17 = vld [vmem:[#allocation8] sm:$0xff] }
 0x456   :  { %5512 = vrot.lane.b32.xlu0 %v5449_v59, %s6824_s10 }
 0x457   :  { %5514 = vrot.lane.b32.xlu1 %v5451_v3, %s6824_s10  ;;  %v7870_v58 = vpop.xlane.xlu1 %2957  ;;  %v5628_v3 = vld [vmem:[#allocation8 + $0x8] sm:$0xff] }
 0x458   :  { %v4204_v23 = vpop.f32.mrb[54].mxu0 }
 0x459   :  { %v5455_v32 = vmul.f32 %v6678_v55, %v4204_v23  ;;  %v6466_v21 = vpop.f32.mrb[55].mxu0  ;;  %v6575_v55 = vpack.c.bf16 %v5628_v3, %v5627_v17 }
 0x45b   :  { %5518 = vrot.lane.b32.xlu1 %v5455_v32, %s6824_s10  ;;  %v4128_v30 = vpop.f32.mrb[46].mxu1  ;;  %6576 = vmatprep.subr.bf16.mxu1 %v6575_v55 }
 0x45c   :  { %v5453_v4 = vmul.f32 %v6680_v46, %v4128_v30  ;;  %v7875_v24 = vpop.xlane.xlu1 %2963  ;;  %v7877_v41 = vpop.xlane.xlu0 %2966  ;;  %6578 = vmatpush3.bf16.msra.mxu1 %v6575_v55 }
 0x45d   :  { %v6461_v10 = vpop.f32.mrb[47].mxu1 }
 0x45e   :  { %5516 = vrot.lane.b32.xlu0 %v5453_v4, %s6824_s10  ;;  %v5629_v4 = vld [vmem:[#allocation8 + $0x10] sm:$0xff]  ;;  %s6834_s10 = smov 24  }
 0x45f   :  { %v4280_v42 = vpop.f32.mrb[48].mxu1  ;;  %v4356_v8 = vpop.f32.mrb[56].mxu0 }
 0x460   :  { %v5459_v51 = vmul.f32 %v6682_v53, %v4356_v8  ;;  %v6471_v50 = vpop.f32.mrb[49].mxu1  ;;  %v6476_v48 = vpop.f32.mrb[57].mxu0  ;;  %v5457_v25 = vmul.f32 %v6684_v57, %v4280_v42 }
 0x461   :  { %v7880_v37 = vpop.xlane.xlu1 %2969  ;;  %v7882_v61 = vpop.xlane.xlu0 %2972 }
 0x462   :  { %5547 = vrot.lane.b32.xlu1 %v5459_v51, %s6833_s5 }
 0x466   :  { %v7885_v36 = vpop.xlane.xlu1 %2975  ;;  %v7887_v22 = vpop.xlane.xlu0 %2978  ;;  %5545 = vrot.lane.b32.xlu1 %v5457_v25, %s6833_s5 }
 0x46b   :  { %v7890_v54 = vpop.xlane.xlu1 %2981  ;;  %v7892_v14 = vpop.xlane.xlu0 %2984 }
 0x46f   :  { %v2904_v56 = vpop.xlane.xlu1 %2903  ;;  %v7894_v28 = vpop.xlane.xlu0 %2990 }
 0x470   :  { %6685 = vrcp.f32 %v2904_v56 }
 0x473   :  { %v2910_v44 = vpop.xlane.xlu1 %2909  ;;  %v2901_v16 = vpop.xlane.xlu0 %2900 }
 0x474   :  { %6687 = vrcp.f32 %v2910_v44 }
 0x475   :  { %6689 = vrcp.f32 %v2901_v16 }
 0x477   :  { %v7896_v18 = vpop.xlane.xlu1 %2987  ;;  %v2907_v11 = vpop.xlane.xlu0 %2906 }
 0x478   :  { %6691 = vrcp.f32 %v2907_v11 }
 0x47a   :  { %v6686_v0 = vpop.eup %6685 }
 0x47b   :  { %v5429_v49 = vmul.f32 %v6686_v0, %v7845_v62  ;;  %v2916_v5 = vpop.xlane.xlu1 %2915  ;;  %v2913_v19 = vpop.xlane.xlu0 %2912 }
 0x47c   :  { %6693 = vrcp.f32 %v2916_v5 }
 0x47d   :  { %5490 = vst.msk [vmem:[#allocation2 + $0x10] sm:$0xff] %vm273_vm2, %v5429_v49  ;;  %6695 = vrcp.f32 %v2913_v19 }
 0x47e   :  { %v6688_v60 = vpop.eup %6687 }
 0x47f   :  { %v6690_v43 = vpop.eup %6689  ;;  %v5433_v35 = vmul.f32 %v6688_v60, %v7853_v7  ;;  %v2919_v12 = vpop.xlane.xlu0 %2918 }
 0x480   :  { %v5427_v47 = vmul.f32 %v6690_v43, %v7847_v45  ;;  %6697 = vrcp.f32 %v2919_v12 }
 0x481   :  { %5492 = vst.msk [vmem:[#allocation2 + $0x20] sm:$0xff] %vm273_vm2, %v5433_v35  ;;  %6699 = vrcp.f32 %v7862_v1 }
 0x482   :  { %5489 = vst.msk [vmem:[#allocation2 + $0x8] sm:$0xff] %vm273_vm2, %v5427_v47  ;;  %v6692_v34 = vpop.eup %6691  ;;  %6701 = vrcp.f32 %v7866_v2 }
 0x483   :  { %v5431_v62 = vmul.f32 %v6692_v34, %v7849_v33  ;;  %6703 = vrcp.f32 %v7872_v9 }
 0x484   :  { %6705 = vrcp.f32 %v7870_v58 }
 0x485   :  { %5491 = vst.msk [vmem:[#allocation2 + $0x18] sm:$0xff] %vm273_vm2, %v5431_v62  ;;  %6707 = vrcp.f32 %v7875_v24  ;;  %v5630_v24 = vld [vmem:[#allocation8 + $0x18] sm:$0xff] }
 0x486   :  { %v6694_v13 = vpop.eup %6693  ;;  %6709 = vrcp.f32 %v7877_v41  ;;  %v6579_v8 = vpack.c.bf16 %v5630_v24, %v5629_v4 }
 0x487   :  { %v6696_v20 = vpop.eup %6695  ;;  %v5437_v27 = vmul.f32 %v6694_v13, %v7858_v52  ;;  %6711 = vrcp.f32 %v7880_v37 }
 0x488   :  { %v5435_v7 = vmul.f32 %v6696_v20, %v7851_v26  ;;  %6713 = vrcp.f32 %v7882_v61  ;;  %6580 = vmatprep.subr.bf16.mxu1 %v6579_v8 }
 0x489   :  { %5494 = vst.msk [vmem:[#allocation2 + $0x30] sm:$0xff] %vm273_vm2, %v5437_v27  ;;  %6715 = vrcp.f32 %v7885_v36  ;;  %6582 = vmatpush3.bf16.msra.mxu1 %v6579_v8 }
 0x48a   :  { %v6698_v45 = vpop.eup %6697  ;;  %5493 = vst.msk [vmem:[#allocation2 + $0x28] sm:$0xff] %vm273_vm2, %v5435_v7  ;;  %6717 = vrcp.f32 %v7887_v22 }
 0x48b   :  { %v5439_v29 = vmul.f32 %v6698_v45, %v7856_v15  ;;  %v6700_v33 = vpop.eup %6699  ;;  %6719 = vrcp.f32 %v7890_v54 }
 0x48c   :  { %v6702_v26 = vpop.eup %6701  ;;  %6721 = vrcp.f32 %v7892_v14 }
 0x48d   :  { %5495 = vst.msk [vmem:[#allocation2 + $0x38] sm:$0xff] %vm273_vm2, %v5439_v29  ;;  %v6704_v15 = vpop.eup %6703  ;;  %6723 = vrcp.f32 %v7894_v28 }
 0x48e   :  { %v6706_v6 = vpop.eup %6705  ;;  %6725 = vrcp.f32 %v7896_v18 }
 0x48f   :  { %v6708_v32 = vpop.eup %6707 }
 0x490   :  { %v4508_v63 = vpop.f32.mrb[58].mxu0  ;;  %v6710_v21 = vpop.eup %6709 }
 0x491   :  { %v5463_v1 = vmul.f32 %v6700_v33, %v4508_v63  ;;  %v6486_v31 = vpop.f32.mrb[59].mxu0  ;;  %v6712_v51 = vpop.eup %6711 }
 0x492   :  { %v6714_v50 = vpop.eup %6713 }
 0x493   :  { %5551 = vrot.lane.b32.xlu1 %v5463_v1, %s6833_s5  ;;  %v6716_v22 = vpop.eup %6715 }
 0x494   :  { %v4432_v52 = vpop.f32.mrb[50].mxu1  ;;  %v6718_v54 = vpop.eup %6717 }
 0x495   :  { %v5461_v2 = vmul.f32 %v6702_v26, %v4432_v52  ;;  %v6481_v38 = vpop.f32.mrb[51].mxu1  ;;  %v6720_v28 = vpop.eup %6719 }
 0x496   :  { %v6722_v49 = vpop.eup %6721 }
 0x497   :  { %5549 = vrot.lane.b32.xlu0 %v5461_v2, %s6833_s5  ;;  %v6724_v18 = vpop.eup %6723 }
 0x498   :  { %v4660_v40 = vpop.f32.mrb[60].mxu0  ;;  %v6726_v47 = vpop.eup %6725 }
 0x499   :  { %v5467_v59 = vmul.f32 %v6704_v15, %v4660_v40  ;;  %v6496_v39 = vpop.f32.mrb[61].mxu0 }
 0x49b   :  { %5555 = vrot.lane.b32.xlu1 %v5467_v59, %s6833_s5 }
 0x49c   :  { %v4584_v58 = vpop.f32.mrb[52].mxu1 }
 0x49d   :  { %v5465_v9 = vmul.f32 %v6706_v6, %v4584_v58  ;;  %v6491_v23 = vpop.f32.mrb[53].mxu1 }
 0x49f   :  { %5553 = vrot.lane.b32.xlu0 %v5465_v9, %s6833_s5 }
 0x4a0   :  { %v4736_v46 = vpop.f32.mrb[54].mxu1  ;;  %v4812_v30 = vpop.f32.mrb[62].mxu0 }
 0x4a1   :  { %v5469_v41 = vmul.f32 %v6708_v32, %v4736_v46  ;;  %v5471_v10 = vmul.f32 %v6710_v21, %v4812_v30  ;;  %v6501_v53 = vpop.f32.mrb[55].mxu1  ;;  %v6506_v42 = vpop.f32.mrb[63].mxu0 }
 0x4a3   :  { %5557 = vrot.lane.b32.xlu0 %v5469_v41, %s6833_s5  ;;  %5559 = vrot.lane.b32.xlu1 %v5471_v10, %s6833_s5 }
 0x4a5   :  { %v4888_v48 = vpop.f32.mrb[56].mxu1  ;;  %v4964_v37 = vpop.f32.mrb[64].mxu0 }
 0x4a6   :  { %v5473_v61 = vmul.f32 %v6712_v51, %v4888_v48  ;;  %v5475_v57 = vmul.f32 %v6714_v50, %v4964_v37  ;;  %v6511_v25 = vpop.f32.mrb[57].mxu1  ;;  %v6516_v36 = vpop.f32.mrb[65].mxu0  ;;  %v7975_v51 = vld [vmem:[%s8148_s4] ss:$0 sm:$0xff]  ;;  %s6835_s4 = smov 32  }
 0x4a8   :  { %5586 = vrot.lane.b32.xlu0 %v5473_v61, %s6834_s10  ;;  %5588 = vrot.lane.b32.xlu1 %v5475_v57, %s6834_s10 }
 0x4aa   :  { %v5040_v56 = vpop.f32.mrb[58].mxu1  ;;  %v5116_v14 = vpop.f32.mrb[66].mxu0 }
 0x4ab   :  { %v5477_v44 = vmul.f32 %v6716_v22, %v5040_v56  ;;  %v5479_v16 = vmul.f32 %v6718_v54, %v5116_v14  ;;  %v6521_v11 = vpop.f32.mrb[59].mxu1  ;;  %v6526_v0 = vpop.f32.mrb[67].mxu0 }
 0x4ad   :  { %5590 = vrot.lane.b32.xlu0 %v5477_v44, %s6834_s10  ;;  %5592 = vrot.lane.b32.xlu1 %v5479_v16, %s6834_s10 }
 0x4af   :  { %v5192_v5 = vpop.f32.mrb[60].mxu1  ;;  %v5268_v19 = vpop.f32.mrb[68].mxu0 }
 0x4b0   :  { %v5481_v60 = vmul.f32 %v6720_v28, %v5192_v5  ;;  %v5483_v43 = vmul.f32 %v6722_v49, %v5268_v19  ;;  %v6531_v35 = vpop.f32.mrb[61].mxu1  ;;  %v6536_v12 = vpop.f32.mrb[69].mxu0 }
 0x4b2   :  { %5594 = vrot.lane.b32.xlu0 %v5481_v60, %s6834_s10  ;;  %5596 = vrot.lane.b32.xlu1 %v5483_v43, %s6834_s10 }
 0x4b3   :  { %v5344_v34 = vpop.f32.mrb[62].mxu1  ;;  %v5420_v62 = vpop.f32.mrb[70].mxu0 }
 0x4b4   :  { %v5485_v13 = vmul.f32 %v6726_v47, %v5344_v34  ;;  %v5487_v20 = vmul.f32 %v6724_v18, %v5420_v62  ;;  %v6541_v27 = vpop.f32.mrb[63].mxu1  ;;  %v6546_v7 = vpop.f32.mrb[71].mxu0 }
 0x4b6   :  { %5598 = vrot.lane.b32.xlu0 %v5485_v13, %s6834_s10  ;;  %5600 = vrot.lane.b32.xlu1 %v5487_v20, %s6834_s10 }
 0x4bc   :  { %v5507_v45 = vpop.permute.xlu0 %5506 }
 0x4bd   :  { %5530 = vst.msk [vmem:[#allocation2 + $0x8] sm:$0xff] %vm5528_vm3, %v5507_v45 }
 0x4c0   :  { %v5505_v29 = vpop.permute.xlu1 %5504 }
 0x4c1   :  { %5529 = vst.msk [vmem:[#allocation2] sm:$0xff] %vm5528_vm3, %v5505_v29 }
 0x4c4   :  { %v5511_v33 = vpop.permute.xlu1 %5510  ;;  %v5509_v63 = vpop.permute.xlu0 %5508 }
 0x4c5   :  { %5532 = vst.msk [vmem:[#allocation2 + $0x18] sm:$0xff] %vm5528_vm3, %v5511_v33  ;;  %5531 = vst.msk [vmem:[#allocation2 + $0x10] sm:$0xff] %vm5528_vm3, %v5509_v63 }
 0x4c8   :  { %v5513_v1 = vpop.permute.xlu0 %5512 }
 0x4c9   :  { %v5515_v31 = vpop.permute.xlu1 %5514  ;;  %5533 = vst.msk [vmem:[#allocation2 + $0x20] sm:$0xff] %vm5528_vm3, %v5513_v1 }
 0x4ca   :  { %5534 = vst.msk [vmem:[#allocation2 + $0x28] sm:$0xff] %vm5528_vm3, %v5515_v31 }
 0x4cd   :  { %v5519_v26 = vpop.permute.xlu1 %5518 }
 0x4ce   :  { %5536 = vst.msk [vmem:[#allocation2 + $0x38] sm:$0xff] %vm5528_vm3, %v5519_v26 }
 0x4d0   :  { %v5517_v52 = vpop.permute.xlu0 %5516 }
 0x4d1   :  { %5535 = vst.msk [vmem:[#allocation2 + $0x30] sm:$0xff] %vm5528_vm3, %v5517_v52 }
 0x4d4   :  { %v5548_v2 = vpop.permute.xlu1 %5547 }
 0x4d5   :  { %5571 = vst.msk [vmem:[#allocation2 + $0x8] sm:$0xff] %vm5569_vm4, %v5548_v2 }
 0x4d8   :  { %v5546_v38 = vpop.permute.xlu1 %5545 }
 0x4d9   :  { %5570 = vst.msk [vmem:[#allocation2] sm:$0xff] %vm5569_vm4, %v5546_v38 }
 0x505   :  { %v5552_v15 = vpop.permute.xlu1 %5551 }
 0x506   :  { %5573 = vst.msk [vmem:[#allocation2 + $0x18] sm:$0xff] %vm5569_vm4, %v5552_v15 }
 0x509   :  { %v5550_v40 = vpop.permute.xlu0 %5549 }
 0x50a   :  { %5572 = vst.msk [vmem:[#allocation2 + $0x10] sm:$0xff] %vm5569_vm4, %v5550_v40 }
 0x50d   :  { %v5556_v59 = vpop.permute.xlu1 %5555 }
 0x50e   :  { %5575 = vst.msk [vmem:[#allocation2 + $0x28] sm:$0xff] %vm5569_vm4, %v5556_v59 }
 0x511   :  { %v5554_v39 = vpop.permute.xlu0 %5553 }
 0x512   :  { %5574 = vst.msk [vmem:[#allocation2 + $0x20] sm:$0xff] %vm5569_vm4, %v5554_v39 }
 0x515   :  { %v5560_v17 = vpop.permute.xlu1 %5559  ;;  %v5558_v3 = vpop.permute.xlu0 %5557 }
 0x516   :  { %5577 = vst.msk [vmem:[#allocation2 + $0x38] sm:$0xff] %vm5569_vm4, %v5560_v17  ;;  %5576 = vst.msk [vmem:[#allocation2 + $0x30] sm:$0xff] %vm5569_vm4, %v5558_v3 }
 0x51a   :  { %v5589_v6 = vpop.permute.xlu1 %5588  ;;  %v5587_v58 = vpop.permute.xlu0 %5586 }
 0x51b   :  { %5612 = vst.msk [vmem:[#allocation2 + $0x8] sm:$0xff] %vm5610_vm5, %v5589_v6  ;;  %5611 = vst.msk [vmem:[#allocation2] sm:$0xff] %vm5610_vm5, %v5587_v58 }
 0x51f   :  { %v5593_v55 = vpop.permute.xlu1 %5592  ;;  %v5591_v9 = vpop.permute.xlu0 %5590 }
 0x520   :  { %5614 = vst.msk [vmem:[#allocation2 + $0x18] sm:$0xff] %vm5610_vm5, %v5593_v55  ;;  %5613 = vst.msk [vmem:[#allocation2 + $0x10] sm:$0xff] %vm5610_vm5, %v5591_v9 }
 0x522   :  { %v5619_v23 = vld [vmem:[#allocation2] sm:$0xff]  ;;  %v5620_v32 = vld [vmem:[#allocation2 + $0x8] sm:$0xff] }
 0x523   :  { %6555 = vmatprep.mubr.msk.f32.mxu1 %vm84_vm0, %v5619_v23 }
 0x524   :  { %v5597_v21 = vpop.permute.xlu1 %5596  ;;  %v5595_v46 = vpop.permute.xlu0 %5594  ;;  %6556 = vmatmul.mubr.msk.f32.vlgmr.msra.gmra.mrb[64].mxu1 %vm84_vm0, %v5620_v32 }
 0x525   :  { %5616 = vst.msk [vmem:[#allocation2 + $0x28] sm:$0xff] %vm5610_vm5, %v5597_v21  ;;  %5615 = vst.msk [vmem:[#allocation2 + $0x20] sm:$0xff] %vm5610_vm5, %v5595_v46 }
 0x527   :  { %v5621_v30 = vld [vmem:[#allocation2 + $0x10] sm:$0xff]  ;;  %v5622_v4 = vld [vmem:[#allocation2 + $0x18] sm:$0xff] }
 0x528   :  { %v5601_v24 = vpop.permute.xlu1 %5600  ;;  %v5599_v41 = vpop.permute.xlu0 %5598  ;;  %6558 = vmatprep.mubr.msk.f32.mxu1 %vm84_vm0, %v5621_v30 }
 0x529   :  { %5618 = vst.msk [vmem:[#allocation2 + $0x38] sm:$0xff] %vm5610_vm5, %v5601_v24  ;;  %5617 = vst.msk [vmem:[#allocation2 + $0x30] sm:$0xff] %vm5610_vm5, %v5599_v41  ;;  %6559 = vmatmul.mubr.msk.f32.gmra.mrb[66].mxu1 %vm84_vm0, %v5622_v4 }
 0x52c   :  { %v5623_v10 = vld [vmem:[#allocation2 + $0x20] sm:$0xff]  ;;  %v5624_v53 = vld [vmem:[#allocation2 + $0x28] sm:$0xff] }
 0x52d   :  { %6561 = vmatprep.mubr.msk.f32.mxu1 %vm84_vm0, %v5623_v10 }
 0x52e   :  { %6562 = vmatmul.mubr.msk.f32.gmra.mrb[68].mxu1 %vm84_vm0, %v5624_v53 }
 0x530   :  { %v5625_v42 = vld [vmem:[#allocation2 + $0x30] sm:$0xff]  ;;  %v5626_v8 = vld [vmem:[#allocation2 + $0x38] sm:$0xff] }
 0x531   :  { %6564 = vmatprep.mubr.msk.f32.mxu1 %vm84_vm0, %v5625_v42 }
 0x532   :  { %6565 = vmatmul.mubr.msk.f32.gmra.mrb[70].mxu1 %vm84_vm0, %v5626_v8 }
 0x5f7   :  { %v6557_v50 = vpop.f32.mrb[64].mxu1 }
 0x5f8   :  { %v7978_v48 = vadd.f32 %v6557_v50, %v7975_v51  ;;  %v5728_v37 = vpop.f32.mrb[65].mxu1 }
 0x5f9   :  { %v7981_v61 = vadd.f32 %v7975_v51, %v5728_v37 }
 0x5fa   :  { %v5890_v57 = vrot.slane %v7978_v48, 5  ;;  %v5872_v25 = vrot.slane %v7978_v48, 4  ;;  %v5818_v36 = vrot.slane %v7978_v48, 1  ;;  %v5908_v22 = vrot.slane %v7978_v48, 6 }
 0x5fb   :  { %v5889_v54 = vrot.slane %v7981_v61, 6  ;;  %v5798_v56 = vrot.slane %v7981_v61, 1  ;;  %v5871_v14 = vrot.slane %v7981_v61, 5  ;;  %v5817_v44 = vrot.slane %v7981_v61, 2 }
 0x5fc   :  { %v6560_v16 = vpop.f32.mrb[66].mxu1  ;;  %v5907_v11 = vrot.slane %v7981_v61, 7  ;;  %v5836_v0 = vrot.slane %v7981_v61, 3  ;;  %v5837_v28 = vrot.slane %v7978_v48, 2  ;;  %v5775_v49 = vrot.slane %v7978_v48, 7 }
 0x5fd   :  { %v7996_v5 = vadd.f32 %v6560_v16, %v7975_v51  ;;  %v5738_v19 = vpop.f32.mrb[67].mxu1  ;;  %v5891_v60 = vsel %vm5776_vm6, %v5890_v57, %v5889_v54  ;;  %v5799_v43 = vsel %vm5776_vm6, %v7978_v48, %v5798_v56  ;;  %v5873_v35 = vsel %vm5776_vm6, %v5872_v25, %v5871_v14 }
 0x5fe   :  { %v8003_v12 = vadd.f32 %v7975_v51, %v5738_v19  ;;  %v5819_v18 = vsel %vm5776_vm6, %v5818_v36, %v5817_v44  ;;  %v5909_v47 = vsel %vm5776_vm6, %v5908_v22, %v5907_v11  ;;  %v8008_v34 = vsel %vm5776_vm6, %v5837_v28, %v5836_v0 }
 0x5ff   :  { %v5894_v62 = vrot.slane %v7996_v5, 3  ;;  %v5802_v13 = vrot.slane %v7996_v5, 6  ;;  %v5876_v20 = vrot.slane %v7996_v5, 2  ;;  %v5821_v27 = vrot.slane %v7996_v5, 7 }
 0x600   :  { %v5892_v7 = vrot.slane %v8003_v12, 4  ;;  %v5800_v45 = vrot.slane %v8003_v12, 7  ;;  %v5874_v29 = vrot.slane %v8003_v12, 3  ;;  %v5820_v33 = vsel %vm5779_vm7, %v8003_v12, %v5819_v18 }
 0x601   :  { %v6563_v63 = vpop.f32.mrb[68].mxu1  ;;  %v5822_v1 = vsel %vm5782_vm8, %v5821_v27, %v5820_v33  ;;  %v5910_v31 = vrot.slane %v8003_v12, 5  ;;  %v5912_v26 = vrot.slane %v7996_v5, 4  ;;  %v5839_v52 = vrot.slane %v8003_v12, 1 }
 0x602   :  { %v8024_v2 = vadd.f32 %v6563_v63, %v7975_v51  ;;  %v5748_v38 = vpop.f32.mrb[69].mxu1  ;;  %v5893_v15 = vsel %vm5779_vm7, %v5892_v7, %v5891_v60  ;;  %v5801_v40 = vsel %vm5779_vm7, %v5800_v45, %v5799_v43  ;;  %v5875_v59 = vsel %vm5779_vm7, %v5874_v29, %v5873_v35 }
 0x603   :  { %v8030_v39 = vadd.f32 %v7975_v51, %v5748_v38  ;;  %v5895_v17 = vsel %vm5782_vm8, %v5894_v62, %v5893_v15  ;;  %v5803_v3 = vsel %vm5782_vm8, %v5802_v13, %v5801_v40  ;;  %v5877_v6 = vsel %vm5782_vm8, %v5876_v20, %v5875_v59 }
 0x604   :  { %v5898_v58 = vrot.slane %v8024_v2, 1  ;;  %v5806_v55 = vrot.slane %v8024_v2, 4  ;;  %v5825_v9 = vrot.slane %v8024_v2, 5  ;;  %v5911_v23 = vsel %vm5779_vm7, %v5910_v31, %v5909_v47 }
 0x605   :  { %v6566_v32 = vpop.f32.mrb[70].mxu1  ;;  %v5896_v21 = vrot.slane %v8030_v39, 2  ;;  %v5804_v46 = vrot.slane %v8030_v39, 5  ;;  %v5878_v30 = vrot.slane %v8030_v39, 1  ;;  %v5823_v4 = vrot.slane %v8030_v39, 6 }
 0x606   :  { %v8044_v24 = vadd.f32 %v6566_v32, %v7975_v51  ;;  %v5758_v41 = vpop.f32.mrb[71].mxu1  ;;  %v5913_v10 = vsel %vm5782_vm8, %v5912_v26, %v5911_v23  ;;  %v5914_v53 = vrot.slane %v8030_v39, 3  ;;  %v5916_v42 = vrot.slane %v8024_v2, 2 }
 0x607   :  { %v8050_v8 = vadd.f32 %v7975_v51, %v5758_v41  ;;  %v5897_v50 = vsel %vm5785_vm9, %v5896_v21, %v5895_v17  ;;  %v5805_v37 = vsel %vm5785_vm9, %v5804_v46, %v5803_v3  ;;  %v5879_v57 = vsel %vm5785_vm9, %v5878_v30, %v5877_v6 }
 0x608   :  { %v5899_v25 = vsel %vm5788_vm11, %v5898_v58, %v5897_v50  ;;  %v5901_v36 = vrot.slane %v8044_v24, 7  ;;  %v5807_v22 = vsel %vm5788_vm11, %v5806_v55, %v5805_v37  ;;  %v5810_v54 = vrot.slane %v8044_v24, 2 }
 0x609   :  { %v5900_v56 = vsel %vm5791_vm10, %v8050_v8, %v5899_v25  ;;  %v5808_v51 = vrot.slane %v8050_v8, 3  ;;  %v5880_v14 = vsel %vm5788_vm11, %v8024_v2, %v5879_v57  ;;  %v5881_v44 = vrot.slane %v8050_v8, 7 }
 0x60a   :  { %v5902_v16 = vsel %vm5794_vm12, %v5901_v36, %v5900_v56  ;;  %v5883_v11 = vrot.slane %v8044_v24, 6  ;;  %v5824_v0 = vsel %vm5785_vm9, %v5823_v4, %v5822_v1  ;;  %v5827_v28 = vrot.slane %v8050_v8, 4 }
 0x60b   :  { %5903 = vrot.lane.b32.xlu1 %v5902_v16, %s6832_s14  ;;  %v5809_v19 = vsel %vm5791_vm10, %v5808_v51, %v5807_v22  ;;  %v5882_v60 = vsel %vm5791_vm10, %v5881_v44, %v5880_v14  ;;  %v5826_v43 = vsel %vm5788_vm11, %v5825_v9, %v5824_v0  ;;  %v5829_v35 = vrot.slane %v8044_v24, 3 }
 0x60c   :  { %v5811_v18 = vsel %vm5794_vm12, %v5810_v54, %v5809_v19  ;;  %v5884_v47 = vsel %vm5794_vm12, %v5883_v11, %v5882_v60  ;;  %v5828_v62 = vsel %vm5791_vm10, %v5827_v28, %v5826_v43  ;;  %v5915_v13 = vsel %vm5785_vm9, %v5914_v53, %v5913_v10 }
 0x60d   :  { %5812 = vrot.lane.b32.xlu0 %v5811_v18, %s6835_s4  ;;  %v5830_v20 = vsel %vm5794_vm12, %v5829_v35, %v5828_v62  ;;  %v5917_v27 = vsel %vm5788_vm11, %v5916_v42, %v5915_v13  ;;  %v5918_v7 = vrot.slane %v8050_v8, 1  ;;  %v5840_v45 = vsel %vm5779_vm7, %v5839_v52, %v8008_v34 }
 0x60e   :  { %v5841_v29 = vsel %vm5782_vm8, %v7996_v5, %v5840_v45  ;;  %v5842_v33 = vrot.slane %v8030_v39, 7  ;;  %v5846_v63 = vrot.slane %v8050_v8, 5  ;;  %v5844_v31 = vrot.slane %v8024_v2, 6 }
 0x60f   :  { %5885 = vrot.lane.b32.xlu1 %v5884_v47, %s6835_s4  ;;  %v5919_v1 = vsel %vm5791_vm10, %v5918_v7, %v5917_v27  ;;  %v5777_v26 = vsel %vm5776_vm6, %v5775_v49, %v7981_v61  ;;  %v5778_v38 = vrot.slane %v8003_v12, 6  ;;  %v5781_v15 = vrot.slane %v7996_v5, 5 }
 0x610   :  { %v5920_v34 = vsel %vm5794_vm12, %v8044_v24, %v5919_v1  ;;  %v5843_v52 = vsel %vm5785_vm9, %v5842_v33, %v5841_v29  ;;  %v5784_v40 = vrot.slane %v8030_v39, 4  ;;  %v5848_v17 = vrot.slane %v8044_v24, 4 }
 0x611   :  { %5831 = vrot.lane.b32.xlu0 %v5830_v20, %s6832_s14  ;;  %v5845_v59 = vsel %vm5788_vm11, %v5844_v31, %v5843_v52  ;;  %v5780_v3 = vsel %vm5779_vm7, %v5778_v38, %v5777_v26  ;;  %v5787_v58 = vrot.slane %v8024_v2, 3  ;;  %v5790_v55 = vrot.slane %v8050_v8, 2 }
 0x612   :  { %v5847_v49 = vsel %vm5791_vm10, %v5846_v63, %v5845_v59  ;;  %v5783_v6 = vsel %vm5782_vm8, %v5781_v15, %v5780_v3  ;;  %v5855_v32 = vrot.slane %v7981_v61, 4  ;;  %v5856_v21 = vrot.slane %v7978_v48, 3 }
 0x613   :  { %5921 = vrot.lane.b32.xlu1 %v5920_v34, %s6831_s13  ;;  %v5849_v9 = vsel %vm5794_vm12, %v5848_v17, %v5847_v49  ;;  %v5786_v23 = vsel %vm5785_vm9, %v5784_v40, %v5783_v6  ;;  %v5793_v30 = vrot.slane %v8044_v24, 1  ;;  %v5858_v4 = vrot.slane %v8003_v12, 2 }
 0x614   :  { %v5789_v46 = vsel %vm5788_vm11, %v5787_v58, %v5786_v23  ;;  %v5857_v10 = vsel %vm5776_vm6, %v5856_v21, %v5855_v32  ;;  %v5860_v53 = vrot.slane %v7996_v5, 1  ;;  %v5863_v42 = vrot.slane %v8024_v2, 7 }
 0x615   :  { %5850 = vrot.lane.b32.xlu0 %v5849_v9, %s6831_s13  ;;  %v5792_v41 = vsel %vm5791_vm10, %v5790_v55, %v5789_v46  ;;  %v5859_v48 = vsel %vm5779_vm7, %v5858_v4, %v5857_v10  ;;  %v5865_v50 = vrot.slane %v8050_v8, 6  ;;  %v5867_v25 = vrot.slane %v8044_v24, 5 }
 0x616   :  { %v5795_v61 = vsel %vm5794_vm12, %v5793_v30, %v5792_v41  ;;  %v5861_v12 = vsel %vm5782_vm8, %v5860_v53, %v5859_v48 }
 0x617   :  { %5797 = vst.msk [vmem:[#allocation9] sm:$0xff] %vm84_vm0, %v5795_v61  ;;  %v5862_v37 = vsel %vm5785_vm9, %v8030_v39, %v5861_v12 }
 0x618   :  { %v5864_v57 = vsel %vm5788_vm11, %v5863_v42, %v5862_v37 }
 0x619   :  { %v5866_v5 = vsel %vm5791_vm10, %v5865_v50, %v5864_v57 }
 0x61a   :  { %v5868_v2 = vsel %vm5794_vm12, %v5867_v25, %v5866_v5 }
 0x61b   :  { %5870 = vst.msk [vmem:[#allocation9 + $0x8] sm:$0xff] %vm84_vm0, %v5868_v2 }
 0x67d   :  { %v5904_v36 = vpop.permute.xlu1 %5903 }
 0x67f   :  { %v5813_v8 = vpop.permute.xlu0 %5812 }
 0x680   :  { %5816 = vst.msk [vmem:[#allocation9] sm:$0xff] %vm5815_vm13, %v5813_v8 }
 0x681   :  { %v5886_v22 = vpop.permute.xlu1 %5885 }
 0x682   :  { %5888 = vst.msk [vmem:[#allocation9 + $0x8] sm:$0xff] %vm5815_vm13, %v5886_v22 }
 0x683   :  { %v5832_v54 = vpop.permute.xlu0 %5831  ;;  %5906 = vst.msk [vmem:[#allocation9 + $0x8] sm:$0xff] %vm5834_vm14, %v5904_v36 }
 0x684   :  { %5835 = vst.msk [vmem:[#allocation9] sm:$0xff] %vm5834_vm14, %v5832_v54 }
 0x685   :  { %v5922_v39 = vpop.permute.xlu1 %5921 }
 0x686   :  { %5924 = vst.msk [vmem:[#allocation9 + $0x8] sm:$0xff] %vm5853_vm15, %v5922_v39 }
 0x687   :  { %v5851_v24 = vpop.permute.xlu0 %5850 }
 0x688   :  { %5854 = vst.msk [vmem:[#allocation9] sm:$0xff] %vm5853_vm15, %v5851_v24 }
 0x689   :  { %6804 = shalt.err (!%p6801_p0)
}
 0x68a   :  { %s6805_s23 = scalar_lea.hbm %s8150_s6, 256 }
 0x68b   :  { %p6806_p1 = scmp.ne.s32.totalorder %s8150_s6, %s6805_s23  ;;  %p6809_p2 = scmp.lt.u32.totalorder %s6805_s23, %s8150_s6 }
 0x68d   :  { %p6811_p3 = pnand %p6809_p2, %p6806_p1 }
 0x68f   :  { %6814 = shalt.err (!%p6811_p3)
}
 0x690   :  { %5934 = dma.vmem_to_hbm [thread:$0]  %s5932_s20, 256, %s8150_s6, [#allocation5]  }
 0x691   :  { %6819 = dma.done.wait [#allocation5], 256  }
 0x692   :  { %6820 = vsyncadd [#allocation5], 4294967040 }
 0x693   :  { %5938 = vsyncpa [#allocation4], 1 }
 0x694   :  { %5939 = vsyncpa [#allocation7], 1 }
 0x695   :  { %5940 = vsyncpa [#allocation5], 1 }

</bundles_post_ra>
